<compile_context>
chip_gen: v7x
topology: tpu7x:2x2x1
jax: 0.10.0
libtpu: 0.0.40
codegen_flags: <defaults>
</compile_context>

<pallas_src>
import functools

import jax
import jax.numpy as jnp
from jax import lax
from jax.experimental import pallas as pl
from jax.experimental.pallas import tpu as pltpu

EPS = 1e-5


def _elu(v):
    # ELU(alpha=1); exp argument clamped so the unselected branch stays finite.
    return jnp.where(v > 0, v, jnp.exp(jnp.minimum(v, 0.0)) - 1.0)


def _bn_fold(o, gamma, beta, inv_m):
    """Training-mode BatchNorm (batch stats, biased variance), centered form."""
    mean = jnp.sum(o, axis=0, keepdims=True) * inv_m
    centered = o - mean
    var = jnp.sum(centered * centered, axis=0, keepdims=True) * inv_m
    return centered * (gamma * lax.rsqrt(var + EPS)) + beta


def _shift_zero(v, d, axis):
    """out[..., i, ...] = v[..., i+d, ...] along `axis`, zero outside bounds."""
    if d == 0:
        return v
    n = v.shape[axis]
    zshape = list(v.shape)
    zshape[axis] = abs(d)
    z = jnp.zeros(zshape, v.dtype)
    if d > 0:
        return jnp.concatenate([lax.slice_in_dim(v, d, n, axis=axis), z],
                               axis=axis)
    return jnp.concatenate([z, lax.slice_in_dim(v, 0, n + d, axis=axis)],
                           axis=axis)


def _bottleneck_kernel(x_ref, w1_ref, w2_ref, w3_ref, bn12_ref, bn3_ref,
                       o_ref, *, n, h, w):
    blk = pl.program_id(0)
    last = pl.num_programs(0) - 1

    m = x_ref.shape[0]
    d_blk = w1_ref.shape[2]
    inv_m = 1.0 / m

    x = x_ref[...]                                  # (M, Cin) bf16, resident

    # ---- conv1 (1x1, this channel block) + bn1 + ELU ------------------------
    o1 = jnp.dot(x, w1_ref[0], preferred_element_type=jnp.float32)
    o1 = _elu(_bn_fold(o1, bn12_ref[0, 0:1, :], bn12_ref[0, 1:2, :], inv_m))

    # ---- conv2 (3x3, block-diagonal grouped weight, stride=1, pad=1) --------
    # 9 shifted taps over the whole fused channel block; each tap feeds ONE
    # (M, D_blk) @ (D_blk, D_blk) MXU matmul and is accumulated immediately.
    o1_nhwd = o1.reshape(n, h, w, d_blk)
    acc2 = jnp.zeros((m, d_blk), jnp.float32)
    for kh in range(3):
        rowv = _shift_zero(o1_nhwd, kh - 1, axis=1)
        for kw in range(3):
            tap = _shift_zero(rowv, kw - 1, axis=2)
            tap = tap.reshape(m, d_blk).astype(jnp.bfloat16)
            acc2 = acc2 + jnp.dot(tap, w2_ref[0, kh * 3 + kw],
                                  preferred_element_type=jnp.float32)
    o2 = _elu(_bn_fold(acc2, bn12_ref[0, 2:3, :], bn12_ref[0, 3:4, :], inv_m))

    # ---- conv3 (1x1): accumulate directly into the resident f32 output -----
    @pl.when(blk == 0)
    def _():
        o_ref[...] = jnp.zeros_like(o_ref)

    o_ref[...] += jnp.dot(o2.astype(jnp.bfloat16), w3_ref[0],
                          preferred_element_type=jnp.float32)

    # ---- finalize on the last channel block: bn3 + residual + ELU ----------
    @pl.when(blk == last)
    def _():
        o3 = _bn_fold(o_ref[...], bn3_ref[0:1, :], bn3_ref[1:2, :], inv_m)
        o_ref[...] = _elu(o3 + x.astype(jnp.float32))   # downsample is None


def bottleneck_forward(x_nhwc, params, *, cardinality, width):
    """NHWC Bottleneck forward (stride=1, downsample=None).

    x_nhwc : (N, H, W, Cin) float32
    params : PyTorch-layout tensors
             (w1 (D,Cin,1,1), w2 (D,width,3,3), w3 (planes,D,1,1),
              g1,b1,g2,b2 (D,), g3,b3 (planes,))
    returns (N, H, W, planes) float32
    """
    (w1_t, w2_t, w3_t, g1, b1, g2, b2, g3, b3) = params
    N, H, W, Cin = x_nhwc.shape
    G, Cw = cardinality, width
    D = G * Cw
    planes = w3_t.shape[0]
    M = N * H * W
    assert planes == Cin, "downsample=None requires planes == inplanes, stride=1"
    assert w1_t.shape[0] == D and w2_t.shape[0] == D and w2_t.shape[1] == Cw

    # ---- channel-block fusion: up to 128 fused channels per grid step ------
    gpb = max(1, min(G, 128 // max(Cw, 1)))     # groups per block
    while G % gpb:
        gpb -= 1
    d_blk = gpb * Cw
    nb = G // gpb

    # ---- weight packing (wrapper side, bf16 matmul operands) ---------------
    # conv1: (D, Cin, 1, 1) -> (NB, Cin, D_blk)
    w1_b = (w1_t[:, :, 0, 0].T.reshape(Cin, nb, d_blk)
            .transpose(1, 0, 2).astype(jnp.bfloat16))
    # conv2: (D, Cw, 3, 3) grouped -> block-diagonal (NB, 9, D_blk, D_blk)
    w2_g = jnp.transpose(w2_t.reshape(G, Cw, Cw, 3, 3),
                         (0, 3, 4, 2, 1)).reshape(G, 9, Cw, Cw)
    w2_bd = jnp.zeros((nb, 9, d_blk, d_blk), jnp.float32)
    for b in range(nb):
        for gi in range(gpb):
            g = b * gpb + gi
            w2_bd = w2_bd.at[b, :, gi * Cw:(gi + 1) * Cw,
                             gi * Cw:(gi + 1) * Cw].set(w2_g[g])
    w2_bd = w2_bd.astype(jnp.bfloat16)
    # conv3: (planes, D, 1, 1) -> (NB, D_blk, planes)
    w3_b = w3_t[:, :, 0, 0].T.reshape(nb, d_blk, planes).astype(jnp.bfloat16)

    # BN params packed: one DMA per block for (g1,b1,g2,b2), one for (g3,b3).
    bn12_b = (jnp.stack([g1, b1, g2, b2]).astype(jnp.float32)
              .reshape(4, nb, d_blk).transpose(1, 0, 2))
    bn3 = jnp.stack([g3, b3]).astype(jnp.float32)            # (2, planes)

    # Lane-dense 2-D input slab, bf16 (halves the biggest DMA).
    x2d = x_nhwc.reshape(M, Cin).astype(jnp.bfloat16)

    # ---- VMEM budget: bf16 x + resident f32 out + conv2 transients + weights
    need = (2 * M * Cin                         # x (bf16, resident)
            + 2 * 4 * M * planes                # output (f32, resident, margin)
            + 8 * 4 * M * d_blk                 # o1 / taps / acc2 / o2 / casts
            + 4 * (Cin * d_blk + 9 * d_blk * d_blk + d_blk * planes)  # 2x bf16
            + (4 << 20))                        # headroom
    try:
        cap = int(pltpu.get_tpu_info().vmem_capacity_bytes) - (16 << 20)
    except Exception:
        cap = 48 << 20                          # safe on v5e/v6e/v7x
    vmem_bytes = int(min(max(need, 8 << 20), max(cap, 16 << 20)))

    kernel = functools.partial(_bottleneck_kernel, n=N, h=H, w=W)
    out2d = pl.pallas_call(
        kernel,
        out_shape=jax.ShapeDtypeStruct((M, planes), jnp.float32),
        grid=(nb,),
        in_specs=[
            pl.BlockSpec((M, Cin), lambda b: (0, 0)),            # x (resident)
            pl.BlockSpec((1, Cin, d_blk), lambda b: (b, 0, 0)),  # w1 block
            pl.BlockSpec((1, 9, d_blk, d_blk), lambda b: (b, 0, 0, 0)),  # w2
            pl.BlockSpec((1, d_blk, planes), lambda b: (b, 0, 0)),       # w3
            pl.BlockSpec((1, 4, d_blk), lambda b: (b, 0, 0)),    # bn1/bn2
            pl.BlockSpec((2, planes), lambda b: (0, 0)),         # bn3
        ],
        out_specs=pl.BlockSpec((M, planes), lambda b: (0, 0)),   # resident acc
        compiler_params=pltpu.CompilerParams(
            # block axis accumulates conv3 into the output -> sequential
            dimension_semantics=("arbitrary",),
            vmem_limit_bytes=vmem_bytes),
    )(x2d, w1_b, w2_bd, w3_b, bn12_b, bn3)

    return out2d.reshape(N, H, W, planes)


# ------------------------- pure-JAX reference (NCHW) -------------------------
def _ref_forward(x, params, *, cardinality):
    (w1_t, w2_t, w3_t, g1, b1, g2, b2, g3, b3) = params
    dn = ('NCHW', 'OIHW', 'NCHW')

    def bn(o, g, b):
        mean = o.mean(axis=(0, 2, 3), keepdims=True)
        var = ((o - mean) ** 2).mean(axis=(0, 2, 3), keepdims=True)
        return ((o - mean) / jnp.sqrt(var + EPS)
                * g.reshape(1, -1, 1, 1) + b.reshape(1, -1, 1, 1))

    def elu(v):
        return jnp.where(v > 0, v, jnp.exp(v) - 1.0)

    out = lax.conv_general_dilated(x, w1_t, (1, 1), 'VALID', dimension_numbers=dn)
    out = elu(bn(out, g1, b1))
    out = lax.conv_general_dilated(out, w2_t, (1, 1), ((1, 1), (1, 1)),
                                   feature_group_count=cardinality,
                                   dimension_numbers=dn)
    out = elu(bn(out, g2, b2))
    out = lax.conv_general_dilated(out, w3_t, (1, 1), 'VALID', dimension_numbers=dn)
    out = bn(out, g3, b3) + x
    return elu(out)


if __name__ == "__main__":
    # Small shapes consistent with the module; downsample=None requires
    # inplanes == planes and stride == 1.
    N, H, W = 2, 8, 8
    inplanes = planes = 64
    width, cardinality = 8, 8
    D = width * cardinality

    key = jax.random.PRNGKey(0)
    ks = jax.random.split(key, 10)
    x_nhwc = jax.random.normal(ks[0], (N, H, W, inplanes), jnp.float32)

    w1_t = 0.1 * jax.random.normal(ks[1], (D, inplanes, 1, 1), jnp.float32)
    w2_t = 0.1 * jax.random.normal(ks[2], (D, width, 3, 3), jnp.float32)
    w3_t = 0.1 * jax.random.normal(ks[3], (planes, D, 1, 1), jnp.float32)
    g1 = 1.0 + 0.1 * jax.random.normal(ks[4], (D,), jnp.float32)
    b1 = 0.1 * jax.random.normal(ks[5], (D,), jnp.float32)
    g2 = 1.0 + 0.1 * jax.random.normal(ks[6], (D,), jnp.float32)
    b2 = 0.1 * jax.random.normal(ks[7], (D,), jnp.float32)
    g3 = 1.0 + 0.1 * jax.random.normal(ks[8], (planes,), jnp.float32)
    b3 = 0.1 * jax.random.normal(ks[9], (planes,), jnp.float32)

    params = (w1_t, w2_t, w3_t, g1, b1, g2, b2, g3, b3)

    fwd = jax.jit(functools.partial(bottleneck_forward,
                                    cardinality=cardinality, width=width))
    out = jax.block_until_ready(fwd(x_nhwc, params))

    # Reference computed in NCHW on a transposed copy of the same input
    # (layout conversion only on the reference path, not the kernel path).
    x_nchw = jnp.transpose(x_nhwc, (0, 3, 1, 2))
    ref = jnp.transpose(_ref_forward(x_nchw, params, cardinality=cardinality),
                        (0, 2, 3, 1))

    assert out.shape == (N, H, W, planes)
    max_err = jnp.max(jnp.abs(out - ref))
    # tolerance accommodates bf16 matmul operands / bf16 input
    # (f32 accumulation, BN and ELU)
    assert jnp.allclose(out, ref, atol=5e-2, rtol=5e-2), (
        f"max abs diff {max_err}")
    print("KERNEL_OK")
</pallas_src>

<mosaic_0001>
module attributes {stable_mosaic.version = 11 : i64} {
  func.func @_bottleneck_kernel(%arg0: i32, %arg1: memref<128x64xbf16, #tpu.memory_space<vmem>>, %arg2: memref<1x64x64xbf16, #tpu.memory_space<vmem>>, %arg3: memref<1x9x64x64xbf16, #tpu.memory_space<vmem>>, %arg4: memref<1x64x64xbf16, #tpu.memory_space<vmem>>, %arg5: memref<1x4x64xf32, #tpu.memory_space<vmem>>, %arg6: memref<2x64xf32, #tpu.memory_space<vmem>>, %arg7: memref<128x64xf32, #tpu.memory_space<vmem>>) attributes {dimension_semantics = [#tpu.dimension_semantics<arbitrary>], iteration_bounds = array<i64: 1>, scalar_prefetch = 0 : i64, scratch_operands = 0 : i64, tpu.core_type = #tpu.core_type<tc>, window_params = [{pipeline_mode = #tpu.pipeline_mode<synchronous>, transform_indices = @transform_0, window_bounds = array<i64: 128, 64>}, {transform_indices = @transform_1, window_bounds = array<i64: 1, 64, 64>}, {transform_indices = @transform_2, window_bounds = array<i64: 1, 9, 64, 64>}, {transform_indices = @transform_3, window_bounds = array<i64: 1, 64, 64>}, {transform_indices = @transform_4, window_bounds = array<i64: 1, 4, 64>}, {pipeline_mode = #tpu.pipeline_mode<synchronous>, transform_indices = @transform_5, window_bounds = array<i64: 2, 64>}, {pipeline_mode = #tpu.pipeline_mode<synchronous>, transform_indices = @transform_6, window_bounds = array<i64: 128, 64>}]} {
    %c0 = arith.constant 0 : index
    %c0_0 = arith.constant 0 : index
    %0 = vector.load %arg1[%c0, %c0_0] : memref<128x64xbf16, #tpu.memory_space<vmem>>, vector<128x64xbf16>
    %c0_1 = arith.constant 0 : index
    %c0_2 = arith.constant 0 : index
    %c0_3 = arith.constant 0 : index
    %1 = vector.load %arg2[%c0_1, %c0_2, %c0_3] : memref<1x64x64xbf16, #tpu.memory_space<vmem>>, vector<1x64x64xbf16>
    %2 = vector.shape_cast %1 : vector<1x64x64xbf16> to vector<64x64xbf16>
    %cst = arith.constant dense<0.000000e+00> : vector<128x64xf32>
    %3 = tpu.matmul %0, %2, %cst {dimension_numbers = #tpu.dot_dimension_numbers<[1], [0], [0], [1], [0, 0, 1, 1], [], []>} : vector<128x64xbf16>, vector<64x64xbf16>, vector<128x64xf32> -> vector<128x64xf32>
    %c0_4 = arith.constant 0 : index
    %c0_5 = arith.constant 0 : index
    %c0_6 = arith.constant 0 : index
    %4 = vector.load %arg5[%c0_4, %c0_5, %c0_6] : memref<1x4x64xf32, #tpu.memory_space<vmem>>, vector<1x1x64xf32>
    %5 = vector.shape_cast %4 : vector<1x1x64xf32> to vector<1x64xf32>
    %c0_7 = arith.constant 0 : index
    %c1 = arith.constant 1 : index
    %c0_8 = arith.constant 0 : index
    %6 = vector.load %arg5[%c0_7, %c1, %c0_8] : memref<1x4x64xf32, #tpu.memory_space<vmem>>, vector<1x1x64xf32>
    %7 = vector.shape_cast %6 : vector<1x1x64xf32> to vector<1x64xf32>
    %cst_9 = arith.constant dense<0.000000e+00> : vector<64xf32>
    %8 = vector.multi_reduction <add>, %3, %cst_9 [0] : vector<128x64xf32> to vector<64xf32>
    %9 = vector.shape_cast %8 : vector<64xf32> to vector<1x64xf32>
    %cst_10 = arith.constant 7.812500e-03 : f32
    %10 = vector.broadcast %cst_10 : f32 to vector<1x64xf32>
    %11 = arith.mulf %9, %10 : vector<1x64xf32>
    %12 = vector.broadcast %11 : vector<1x64xf32> to vector<128x64xf32>
    %13 = arith.subf %3, %12 : vector<128x64xf32>
    %14 = arith.mulf %13, %13 : vector<128x64xf32>
    %cst_11 = arith.constant dense<0.000000e+00> : vector<64xf32>
    %15 = vector.multi_reduction <add>, %14, %cst_11 [0] : vector<128x64xf32> to vector<64xf32>
    %16 = vector.shape_cast %15 : vector<64xf32> to vector<1x64xf32>
    %cst_12 = arith.constant 7.812500e-03 : f32
    %17 = vector.broadcast %cst_12 : f32 to vector<1x64xf32>
    %18 = arith.mulf %16, %17 : vector<1x64xf32>
    %cst_13 = arith.constant 9.99999974E-6 : f32
    %19 = vector.broadcast %cst_13 : f32 to vector<1x64xf32>
    %20 = arith.addf %18, %19 : vector<1x64xf32>
    %21 = math.rsqrt %20 : vector<1x64xf32>
    %22 = arith.mulf %5, %21 : vector<1x64xf32>
    %23 = vector.broadcast %22 : vector<1x64xf32> to vector<128x64xf32>
    %24 = arith.mulf %13, %23 : vector<128x64xf32>
    %25 = vector.broadcast %7 : vector<1x64xf32> to vector<128x64xf32>
    %26 = arith.addf %24, %25 : vector<128x64xf32>
    %cst_14 = arith.constant 0.000000e+00 : f32
    %27 = vector.broadcast %cst_14 : f32 to vector<128x64xf32>
    %28 = arith.cmpf ogt, %26, %27 : vector<128x64xf32>
    %cst_15 = arith.constant 0.000000e+00 : f32
    %29 = vector.broadcast %cst_15 : f32 to vector<128x64xf32>
    %30 = arith.minimumf %26, %29 : vector<128x64xf32>
    %31 = math.exp %30 : vector<128x64xf32>
    %cst_16 = arith.constant 1.000000e+00 : f32
    %32 = vector.broadcast %cst_16 : f32 to vector<128x64xf32>
    %33 = arith.subf %31, %32 : vector<128x64xf32>
    %34 = arith.select %28, %26, %33 : vector<128x64xi1>, vector<128x64xf32>
    %35 = vector.shape_cast %34 : vector<128x64xf32> to vector<2x8x8x64xf32>
    %cst_17 = arith.constant 0.000000e+00 : f32
    %36 = vector.broadcast %cst_17 : f32 to vector<128x64xf32>
    %cst_18 = arith.constant 0.000000e+00 : f32
    %37 = vector.broadcast %cst_18 : f32 to vector<2x1x8x64xf32>
    %38 = vector.extract_strided_slice %35 {offsets = [0, 0, 0, 0], sizes = [2, 7, 8, 64], strides = [1, 1, 1, 1]} : vector<2x8x8x64xf32> to vector<2x7x8x64xf32>
    %39 = tpu.concatenate %37, %38 in 1 : vector<2x1x8x64xf32>, vector<2x7x8x64xf32> -> vector<2x8x8x64xf32>
    %cst_19 = arith.constant 0.000000e+00 : f32
    %40 = vector.broadcast %cst_19 : f32 to vector<2x8x1x64xf32>
    %41 = vector.extract_strided_slice %39 {offsets = [0, 0, 0, 0], sizes = [2, 8, 7, 64], strides = [1, 1, 1, 1]} : vector<2x8x8x64xf32> to vector<2x8x7x64xf32>
    %42 = tpu.concatenate %40, %41 in 2 : vector<2x8x1x64xf32>, vector<2x8x7x64xf32> -> vector<2x8x8x64xf32>
    %43 = vector.shape_cast %42 : vector<2x8x8x64xf32> to vector<128x64xf32>
    %44 = arith.truncf %43 : vector<128x64xf32> to vector<128x64xbf16>
    %c0_20 = arith.constant 0 : index
    %c0_21 = arith.constant 0 : index
    %c0_22 = arith.constant 0 : index
    %c0_23 = arith.constant 0 : index
    %45 = vector.load %arg3[%c0_20, %c0_21, %c0_22, %c0_23] : memref<1x9x64x64xbf16, #tpu.memory_space<vmem>>, vector<1x1x64x64xbf16>
    %46 = vector.shape_cast %45 : vector<1x1x64x64xbf16> to vector<64x64xbf16>
    %cst_24 = arith.constant dense<0.000000e+00> : vector<128x64xf32>
    %47 = tpu.matmul %44, %46, %cst_24 {dimension_numbers = #tpu.dot_dimension_numbers<[1], [0], [0], [1], [0, 0, 1, 1], [], []>} : vector<128x64xbf16>, vector<64x64xbf16>, vector<128x64xf32> -> vector<128x64xf32>
    %48 = arith.addf %36, %47 : vector<128x64xf32>
    %49 = vector.shape_cast %39 : vector<2x8x8x64xf32> to vector<128x64xf32>
    %50 = arith.truncf %49 : vector<128x64xf32> to vector<128x64xbf16>
    %c0_25 = arith.constant 0 : index
    %c1_26 = arith.constant 1 : index
    %c0_27 = arith.constant 0 : index
    %c0_28 = arith.constant 0 : index
    %51 = vector.load %arg3[%c0_25, %c1_26, %c0_27, %c0_28] : memref<1x9x64x64xbf16, #tpu.memory_space<vmem>>, vector<1x1x64x64xbf16>
    %52 = vector.shape_cast %51 : vector<1x1x64x64xbf16> to vector<64x64xbf16>
    %cst_29 = arith.constant dense<0.000000e+00> : vector<128x64xf32>
    %53 = tpu.matmul %50, %52, %cst_29 {dimension_numbers = #tpu.dot_dimension_numbers<[1], [0], [0], [1], [0, 0, 1, 1], [], []>} : vector<128x64xbf16>, vector<64x64xbf16>, vector<128x64xf32> -> vector<128x64xf32>
    %54 = arith.addf %48, %53 : vector<128x64xf32>
    %cst_30 = arith.constant 0.000000e+00 : f32
    %55 = vector.broadcast %cst_30 : f32 to vector<2x8x1x64xf32>
    %56 = vector.extract_strided_slice %39 {offsets = [0, 0, 1, 0], sizes = [2, 8, 7, 64], strides = [1, 1, 1, 1]} : vector<2x8x8x64xf32> to vector<2x8x7x64xf32>
    %57 = tpu.concatenate %56, %55 in 2 : vector<2x8x7x64xf32>, vector<2x8x1x64xf32> -> vector<2x8x8x64xf32>
    %58 = vector.shape_cast %57 : vector<2x8x8x64xf32> to vector<128x64xf32>
    %59 = arith.truncf %58 : vector<128x64xf32> to vector<128x64xbf16>
    %c0_31 = arith.constant 0 : index
    %c2 = arith.constant 2 : index
    %c0_32 = arith.constant 0 : index
    %c0_33 = arith.constant 0 : index
    %60 = vector.load %arg3[%c0_31, %c2, %c0_32, %c0_33] : memref<1x9x64x64xbf16, #tpu.memory_space<vmem>>, vector<1x1x64x64xbf16>
    %61 = vector.shape_cast %60 : vector<1x1x64x64xbf16> to vector<64x64xbf16>
    %cst_34 = arith.constant dense<0.000000e+00> : vector<128x64xf32>
    %62 = tpu.matmul %59, %61, %cst_34 {dimension_numbers = #tpu.dot_dimension_numbers<[1], [0], [0], [1], [0, 0, 1, 1], [], []>} : vector<128x64xbf16>, vector<64x64xbf16>, vector<128x64xf32> -> vector<128x64xf32>
    %63 = arith.addf %54, %62 : vector<128x64xf32>
    %cst_35 = arith.constant 0.000000e+00 : f32
    %64 = vector.broadcast %cst_35 : f32 to vector<2x8x1x64xf32>
    %65 = vector.extract_strided_slice %35 {offsets = [0, 0, 0, 0], sizes = [2, 8, 7, 64], strides = [1, 1, 1, 1]} : vector<2x8x8x64xf32> to vector<2x8x7x64xf32>
    %66 = tpu.concatenate %64, %65 in 2 : vector<2x8x1x64xf32>, vector<2x8x7x64xf32> -> vector<2x8x8x64xf32>
    %67 = vector.shape_cast %66 : vector<2x8x8x64xf32> to vector<128x64xf32>
    %68 = arith.truncf %67 : vector<128x64xf32> to vector<128x64xbf16>
    %c0_36 = arith.constant 0 : index
    %c3 = arith.constant 3 : index
    %c0_37 = arith.constant 0 : index
    %c0_38 = arith.constant 0 : index
    %69 = vector.load %arg3[%c0_36, %c3, %c0_37, %c0_38] : memref<1x9x64x64xbf16, #tpu.memory_space<vmem>>, vector<1x1x64x64xbf16>
    %70 = vector.shape_cast %69 : vector<1x1x64x64xbf16> to vector<64x64xbf16>
    %cst_39 = arith.constant dense<0.000000e+00> : vector<128x64xf32>
    %71 = tpu.matmul %68, %70, %cst_39 {dimension_numbers = #tpu.dot_dimension_numbers<[1], [0], [0], [1], [0, 0, 1, 1], [], []>} : vector<128x64xbf16>, vector<64x64xbf16>, vector<128x64xf32> -> vector<128x64xf32>
    %72 = arith.addf %63, %71 : vector<128x64xf32>
    %73 = vector.shape_cast %35 : vector<2x8x8x64xf32> to vector<128x64xf32>
    %74 = arith.truncf %73 : vector<128x64xf32> to vector<128x64xbf16>
    %c0_40 = arith.constant 0 : index
    %c4 = arith.constant 4 : index
    %c0_41 = arith.constant 0 : index
    %c0_42 = arith.constant 0 : index
    %75 = vector.load %arg3[%c0_40, %c4, %c0_41, %c0_42] : memref<1x9x64x64xbf16, #tpu.memory_space<vmem>>, vector<1x1x64x64xbf16>
    %76 = vector.shape_cast %75 : vector<1x1x64x64xbf16> to vector<64x64xbf16>
    %cst_43 = arith.constant dense<0.000000e+00> : vector<128x64xf32>
    %77 = tpu.matmul %74, %76, %cst_43 {dimension_numbers = #tpu.dot_dimension_numbers<[1], [0], [0], [1], [0, 0, 1, 1], [], []>} : vector<128x64xbf16>, vector<64x64xbf16>, vector<128x64xf32> -> vector<128x64xf32>
    %78 = arith.addf %72, %77 : vector<128x64xf32>
    %cst_44 = arith.constant 0.000000e+00 : f32
    %79 = vector.broadcast %cst_44 : f32 to vector<2x8x1x64xf32>
    %80 = vector.extract_strided_slice %35 {offsets = [0, 0, 1, 0], sizes = [2, 8, 7, 64], strides = [1, 1, 1, 1]} : vector<2x8x8x64xf32> to vector<2x8x7x64xf32>
    %81 = tpu.concatenate %80, %79 in 2 : vector<2x8x7x64xf32>, vector<2x8x1x64xf32> -> vector<2x8x8x64xf32>
    %82 = vector.shape_cast %81 : vector<2x8x8x64xf32> to vector<128x64xf32>
    %83 = arith.truncf %82 : vector<128x64xf32> to vector<128x64xbf16>
    %c0_45 = arith.constant 0 : index
    %c5 = arith.constant 5 : index
    %c0_46 = arith.constant 0 : index
    %c0_47 = arith.constant 0 : index
    %84 = vector.load %arg3[%c0_45, %c5, %c0_46, %c0_47] : memref<1x9x64x64xbf16, #tpu.memory_space<vmem>>, vector<1x1x64x64xbf16>
    %85 = vector.shape_cast %84 : vector<1x1x64x64xbf16> to vector<64x64xbf16>
    %cst_48 = arith.constant dense<0.000000e+00> : vector<128x64xf32>
    %86 = tpu.matmul %83, %85, %cst_48 {dimension_numbers = #tpu.dot_dimension_numbers<[1], [0], [0], [1], [0, 0, 1, 1], [], []>} : vector<128x64xbf16>, vector<64x64xbf16>, vector<128x64xf32> -> vector<128x64xf32>
    %87 = arith.addf %78, %86 : vector<128x64xf32>
    %cst_49 = arith.constant 0.000000e+00 : f32
    %88 = vector.broadcast %cst_49 : f32 to vector<2x1x8x64xf32>
    %89 = vector.extract_strided_slice %35 {offsets = [0, 1, 0, 0], sizes = [2, 7, 8, 64], strides = [1, 1, 1, 1]} : vector<2x8x8x64xf32> to vector<2x7x8x64xf32>
    %90 = tpu.concatenate %89, %88 in 1 : vector<2x7x8x64xf32>, vector<2x1x8x64xf32> -> vector<2x8x8x64xf32>
    %cst_50 = arith.constant 0.000000e+00 : f32
    %91 = vector.broadcast %cst_50 : f32 to vector<2x8x1x64xf32>
    %92 = vector.extract_strided_slice %90 {offsets = [0, 0, 0, 0], sizes = [2, 8, 7, 64], strides = [1, 1, 1, 1]} : vector<2x8x8x64xf32> to vector<2x8x7x64xf32>
    %93 = tpu.concatenate %91, %92 in 2 : vector<2x8x1x64xf32>, vector<2x8x7x64xf32> -> vector<2x8x8x64xf32>
    %94 = vector.shape_cast %93 : vector<2x8x8x64xf32> to vector<128x64xf32>
    %95 = arith.truncf %94 : vector<128x64xf32> to vector<128x64xbf16>
    %c0_51 = arith.constant 0 : index
    %c6 = arith.constant 6 : index
    %c0_52 = arith.constant 0 : index
    %c0_53 = arith.constant 0 : index
    %96 = vector.load %arg3[%c0_51, %c6, %c0_52, %c0_53] : memref<1x9x64x64xbf16, #tpu.memory_space<vmem>>, vector<1x1x64x64xbf16>
    %97 = vector.shape_cast %96 : vector<1x1x64x64xbf16> to vector<64x64xbf16>
    %cst_54 = arith.constant dense<0.000000e+00> : vector<128x64xf32>
    %98 = tpu.matmul %95, %97, %cst_54 {dimension_numbers = #tpu.dot_dimension_numbers<[1], [0], [0], [1], [0, 0, 1, 1], [], []>} : vector<128x64xbf16>, vector<64x64xbf16>, vector<128x64xf32> -> vector<128x64xf32>
    %99 = arith.addf %87, %98 : vector<128x64xf32>
    %100 = vector.shape_cast %90 : vector<2x8x8x64xf32> to vector<128x64xf32>
    %101 = arith.truncf %100 : vector<128x64xf32> to vector<128x64xbf16>
    %c0_55 = arith.constant 0 : index
    %c7 = arith.constant 7 : index
    %c0_56 = arith.constant 0 : index
    %c0_57 = arith.constant 0 : index
    %102 = vector.load %arg3[%c0_55, %c7, %c0_56, %c0_57] : memref<1x9x64x64xbf16, #tpu.memory_space<vmem>>, vector<1x1x64x64xbf16>
    %103 = vector.shape_cast %102 : vector<1x1x64x64xbf16> to vector<64x64xbf16>
    %cst_58 = arith.constant dense<0.000000e+00> : vector<128x64xf32>
    %104 = tpu.matmul %101, %103, %cst_58 {dimension_numbers = #tpu.dot_dimension_numbers<[1], [0], [0], [1], [0, 0, 1, 1], [], []>} : vector<128x64xbf16>, vector<64x64xbf16>, vector<128x64xf32> -> vector<128x64xf32>
    %105 = arith.addf %99, %104 : vector<128x64xf32>
    %cst_59 = arith.constant 0.000000e+00 : f32
    %106 = vector.broadcast %cst_59 : f32 to vector<2x8x1x64xf32>
    %107 = vector.extract_strided_slice %90 {offsets = [0, 0, 1, 0], sizes = [2, 8, 7, 64], strides = [1, 1, 1, 1]} : vector<2x8x8x64xf32> to vector<2x8x7x64xf32>
    %108 = tpu.concatenate %107, %106 in 2 : vector<2x8x7x64xf32>, vector<2x8x1x64xf32> -> vector<2x8x8x64xf32>
    %109 = vector.shape_cast %108 : vector<2x8x8x64xf32> to vector<128x64xf32>
    %110 = arith.truncf %109 : vector<128x64xf32> to vector<128x64xbf16>
    %c0_60 = arith.constant 0 : index
    %c8 = arith.constant 8 : index
    %c0_61 = arith.constant 0 : index
    %c0_62 = arith.constant 0 : index
    %111 = vector.load %arg3[%c0_60, %c8, %c0_61, %c0_62] : memref<1x9x64x64xbf16, #tpu.memory_space<vmem>>, vector<1x1x64x64xbf16>
    %112 = vector.shape_cast %111 : vector<1x1x64x64xbf16> to vector<64x64xbf16>
    %cst_63 = arith.constant dense<0.000000e+00> : vector<128x64xf32>
    %113 = tpu.matmul %110, %112, %cst_63 {dimension_numbers = #tpu.dot_dimension_numbers<[1], [0], [0], [1], [0, 0, 1, 1], [], []>} : vector<128x64xbf16>, vector<64x64xbf16>, vector<128x64xf32> -> vector<128x64xf32>
    %114 = arith.addf %105, %113 : vector<128x64xf32>
    %c0_64 = arith.constant 0 : index
    %c2_65 = arith.constant 2 : index
    %c0_66 = arith.constant 0 : index
    %115 = vector.load %arg5[%c0_64, %c2_65, %c0_66] : memref<1x4x64xf32, #tpu.memory_space<vmem>>, vector<1x1x64xf32>
    %116 = vector.shape_cast %115 : vector<1x1x64xf32> to vector<1x64xf32>
    %c0_67 = arith.constant 0 : index
    %c3_68 = arith.constant 3 : index
    %c0_69 = arith.constant 0 : index
    %117 = vector.load %arg5[%c0_67, %c3_68, %c0_69] : memref<1x4x64xf32, #tpu.memory_space<vmem>>, vector<1x1x64xf32>
    %118 = vector.shape_cast %117 : vector<1x1x64xf32> to vector<1x64xf32>
    %cst_70 = arith.constant dense<0.000000e+00> : vector<64xf32>
    %119 = vector.multi_reduction <add>, %114, %cst_70 [0] : vector<128x64xf32> to vector<64xf32>
    %120 = vector.shape_cast %119 : vector<64xf32> to vector<1x64xf32>
    %cst_71 = arith.constant 7.812500e-03 : f32
    %121 = vector.broadcast %cst_71 : f32 to vector<1x64xf32>
    %122 = arith.mulf %120, %121 : vector<1x64xf32>
    %123 = vector.broadcast %122 : vector<1x64xf32> to vector<128x64xf32>
    %124 = arith.subf %114, %123 : vector<128x64xf32>
    %125 = arith.mulf %124, %124 : vector<128x64xf32>
    %cst_72 = arith.constant dense<0.000000e+00> : vector<64xf32>
    %126 = vector.multi_reduction <add>, %125, %cst_72 [0] : vector<128x64xf32> to vector<64xf32>
    %127 = vector.shape_cast %126 : vector<64xf32> to vector<1x64xf32>
    %cst_73 = arith.constant 7.812500e-03 : f32
    %128 = vector.broadcast %cst_73 : f32 to vector<1x64xf32>
    %129 = arith.mulf %127, %128 : vector<1x64xf32>
    %cst_74 = arith.constant 9.99999974E-6 : f32
    %130 = vector.broadcast %cst_74 : f32 to vector<1x64xf32>
    %131 = arith.addf %129, %130 : vector<1x64xf32>
    %132 = math.rsqrt %131 : vector<1x64xf32>
    %133 = arith.mulf %116, %132 : vector<1x64xf32>
    %134 = vector.broadcast %133 : vector<1x64xf32> to vector<128x64xf32>
    %135 = arith.mulf %124, %134 : vector<128x64xf32>
    %136 = vector.broadcast %118 : vector<1x64xf32> to vector<128x64xf32>
    %137 = arith.addf %135, %136 : vector<128x64xf32>
    %cst_75 = arith.constant 0.000000e+00 : f32
    %138 = vector.broadcast %cst_75 : f32 to vector<128x64xf32>
    %139 = arith.cmpf ogt, %137, %138 : vector<128x64xf32>
    %cst_76 = arith.constant 0.000000e+00 : f32
    %140 = vector.broadcast %cst_76 : f32 to vector<128x64xf32>
    %141 = arith.minimumf %137, %140 : vector<128x64xf32>
    %142 = math.exp %141 : vector<128x64xf32>
    %cst_77 = arith.constant 1.000000e+00 : f32
    %143 = vector.broadcast %cst_77 : f32 to vector<128x64xf32>
    %144 = arith.subf %142, %143 : vector<128x64xf32>
    %145 = arith.select %139, %137, %144 : vector<128x64xi1>, vector<128x64xf32>
    %c0_i32 = arith.constant 0 : i32
    %146 = arith.cmpi eq, %arg0, %c0_i32 : i32
    %147 = arith.extui %146 : i1 to i32
    %c0_i32_78 = arith.constant 0 : i32
    %148 = arith.cmpi ne, %147, %c0_i32_78 : i32
    scf.if %148 {
      %cst_89 = arith.constant 0.000000e+00 : f32
      %159 = vector.broadcast %cst_89 : f32 to vector<128x64xf32>
      %c0_90 = arith.constant 0 : index
      %c0_91 = arith.constant 0 : index
      %160 = vector.load %arg7[%c0_90, %c0_91] : memref<128x64xf32, #tpu.memory_space<vmem>>, vector<128x64xf32>
      tpu.vector_store %arg7[%c0_90, %c0_91], %159 {strides = array<i32>} : memref<128x64xf32, #tpu.memory_space<vmem>>, vector<128x64xf32>,
    } else {
    }
    %c0_79 = arith.constant 0 : index
    %c0_80 = arith.constant 0 : index
    %149 = vector.load %arg7[%c0_79, %c0_80] : memref<128x64xf32, #tpu.memory_space<vmem>>, vector<128x64xf32>
    %150 = arith.truncf %145 : vector<128x64xf32> to vector<128x64xbf16>
    %c0_81 = arith.constant 0 : index
    %c0_82 = arith.constant 0 : index
    %c0_83 = arith.constant 0 : index
    %151 = vector.load %arg4[%c0_81, %c0_82, %c0_83] : memref<1x64x64xbf16, #tpu.memory_space<vmem>>, vector<1x64x64xbf16>
    %152 = vector.shape_cast %151 : vector<1x64x64xbf16> to vector<64x64xbf16>
    %cst_84 = arith.constant dense<0.000000e+00> : vector<128x64xf32>
    %153 = tpu.matmul %150, %152, %cst_84 {dimension_numbers = #tpu.dot_dimension_numbers<[1], [0], [0], [1], [0, 0, 1, 1], [], []>} : vector<128x64xbf16>, vector<64x64xbf16>, vector<128x64xf32> -> vector<128x64xf32>
    %154 = arith.addf %149, %153 : vector<128x64xf32>
    %c0_85 = arith.constant 0 : index
    %c0_86 = arith.constant 0 : index
    %155 = vector.load %arg7[%c0_85, %c0_86] : memref<128x64xf32, #tpu.memory_space<vmem>>, vector<128x64xf32>
    tpu.vector_store %arg7[%c0_85, %c0_86], %154 {strides = array<i32>} : memref<128x64xf32, #tpu.memory_space<vmem>>, vector<128x64xf32>,
    %c0_i32_87 = arith.constant 0 : i32
    %156 = arith.cmpi eq, %arg0, %c0_i32_87 : i32
    %157 = arith.extui %156 : i1 to i32
    %c0_i32_88 = arith.constant 0 : i32
    %158 = arith.cmpi ne, %157, %c0_i32_88 : i32
    scf.if %158 {
      %c0_89 = arith.constant 0 : index
      %c0_90 = arith.constant 0 : index
      %159 = vector.load %arg7[%c0_89, %c0_90] : memref<128x64xf32, #tpu.memory_space<vmem>>, vector<128x64xf32>
      %c0_91 = arith.constant 0 : index
      %c0_92 = arith.constant 0 : index
      %160 = vector.load %arg6[%c0_91, %c0_92] : memref<2x64xf32, #tpu.memory_space<vmem>>, vector<1x64xf32>
      %c1_93 = arith.constant 1 : index
      %c0_94 = arith.constant 0 : index
      %161 = vector.load %arg6[%c1_93, %c0_94] : memref<2x64xf32, #tpu.memory_space<vmem>>, vector<1x64xf32>
      %cst_95 = arith.constant dense<0.000000e+00> : vector<64xf32>
      %162 = vector.multi_reduction <add>, %159, %cst_95 [0] : vector<128x64xf32> to vector<64xf32>
      %163 = vector.shape_cast %162 : vector<64xf32> to vector<1x64xf32>
      %cst_96 = arith.constant 7.812500e-03 : f32
      %164 = vector.broadcast %cst_96 : f32 to vector<1x64xf32>
      %165 = arith.mulf %163, %164 : vector<1x64xf32>
      %166 = vector.broadcast %165 : vector<1x64xf32> to vector<128x64xf32>
      %167 = arith.subf %159, %166 : vector<128x64xf32>
      %168 = arith.mulf %167, %167 : vector<128x64xf32>
      %cst_97 = arith.constant dense<0.000000e+00> : vector<64xf32>
      %169 = vector.multi_reduction <add>, %168, %cst_97 [0] : vector<128x64xf32> to vector<64xf32>
      %170 = vector.shape_cast %169 : vector<64xf32> to vector<1x64xf32>
      %cst_98 = arith.constant 7.812500e-03 : f32
      %171 = vector.broadcast %cst_98 : f32 to vector<1x64xf32>
      %172 = arith.mulf %170, %171 : vector<1x64xf32>
      %cst_99 = arith.constant 9.99999974E-6 : f32
      %173 = vector.broadcast %cst_99 : f32 to vector<1x64xf32>
      %174 = arith.addf %172, %173 : vector<1x64xf32>
      %175 = math.rsqrt %174 : vector<1x64xf32>
      %176 = arith.mulf %160, %175 : vector<1x64xf32>
      %177 = vector.broadcast %176 : vector<1x64xf32> to vector<128x64xf32>
      %178 = arith.mulf %167, %177 : vector<128x64xf32>
      %179 = vector.broadcast %161 : vector<1x64xf32> to vector<128x64xf32>
      %180 = arith.addf %178, %179 : vector<128x64xf32>
      %181 = arith.extf %0 : vector<128x64xbf16> to vector<128x64xf32>
      %182 = arith.addf %180, %181 : vector<128x64xf32>
      %cst_100 = arith.constant 0.000000e+00 : f32
      %183 = vector.broadcast %cst_100 : f32 to vector<128x64xf32>
      %184 = arith.cmpf ogt, %182, %183 : vector<128x64xf32>
      %cst_101 = arith.constant 0.000000e+00 : f32
      %185 = vector.broadcast %cst_101 : f32 to vector<128x64xf32>
      %186 = arith.minimumf %182, %185 : vector<128x64xf32>
      %187 = math.exp %186 : vector<128x64xf32>
      %cst_102 = arith.constant 1.000000e+00 : f32
      %188 = vector.broadcast %cst_102 : f32 to vector<128x64xf32>
      %189 = arith.subf %187, %188 : vector<128x64xf32>
      %190 = arith.select %184, %182, %189 : vector<128x64xi1>, vector<128x64xf32>
      %c0_103 = arith.constant 0 : index
      %c0_104 = arith.constant 0 : index
      %191 = vector.load %arg7[%c0_103, %c0_104] : memref<128x64xf32, #tpu.memory_space<vmem>>, vector<128x64xf32>
      tpu.vector_store %arg7[%c0_103, %c0_104], %190 {strides = array<i32>} : memref<128x64xf32, #tpu.memory_space<vmem>>, vector<128x64xf32>,
    } else {
    }
    return
  }
  func.func @transform_0(%arg0: i32) -> (i32, i32) {
    %c0_i32 = arith.constant 0 : i32
    %c0_i32_0 = arith.constant 0 : i32
    %c0_i32_1 = arith.constant 0 : i32
    return %c0_i32, %c0_i32_0 : i32, i32
  }
  func.func @transform_1(%arg0: i32) -> (i32, i32, i32) {
    %c0_i32 = arith.constant 0 : i32
    %c0_i32_0 = arith.constant 0 : i32
    %c0_i32_1 = arith.constant 0 : i32
    return %arg0, %c0_i32, %c0_i32_0 : i32, i32, i32
  }
  func.func @transform_2(%arg0: i32) -> (i32, i32, i32, i32) {
    %c0_i32 = arith.constant 0 : i32
    %c0_i32_0 = arith.constant 0 : i32
    %c0_i32_1 = arith.constant 0 : i32
    %c0_i32_2 = arith.constant 0 : i32
    return %arg0, %c0_i32, %c0_i32_0, %c0_i32_1 : i32, i32, i32, i32
  }
  func.func @transform_3(%arg0: i32) -> (i32, i32, i32) {
    %c0_i32 = arith.constant 0 : i32
    %c0_i32_0 = arith.constant 0 : i32
    %c0_i32_1 = arith.constant 0 : i32
    return %arg0, %c0_i32, %c0_i32_0 : i32, i32, i32
  }
  func.func @transform_4(%arg0: i32) -> (i32, i32, i32) {
    %c0_i32 = arith.constant 0 : i32
    %c0_i32_0 = arith.constant 0 : i32
    %c0_i32_1 = arith.constant 0 : i32
    return %arg0, %c0_i32, %c0_i32_0 : i32, i32, i32
  }
  func.func @transform_5(%arg0: i32) -> (i32, i32) {
    %c0_i32 = arith.constant 0 : i32
    %c0_i32_0 = arith.constant 0 : i32
    %c0_i32_1 = arith.constant 0 : i32
    return %c0_i32, %c0_i32_0 : i32, i32
  }
  func.func @transform_6(%arg0: i32) -> (i32, i32) {
    %c0_i32 = arith.constant 0 : i32
    %c0_i32_0 = arith.constant 0 : i32
    %c0_i32_1 = arith.constant 0 : i32
    return %c0_i32, %c0_i32_0 : i32, i32
  }
}

</mosaic_0001>

<bundles_post_ra>
// kernel: bottleneck_forward.1
= control target key start
LH: loop header
LB: loop body
LE: loop exit
PB: predicated region body
PF: predicated region fallthrough
CT: control target
= control target key end

     0   :  { %vm113_vm0 = vcmask 523264   ;;  %s5542_s0 = inlined_call_operand.vmem [shape: bf16[128,64], index: 0, kind: input, shape index: {}]   ;;  %s5543_s1 = inlined_call_operand.vmem [shape: bf16[1,64,64], index: 1, kind: input, shape index: {}]   ;;  %s5544_s2 = inlined_call_operand.vmem [shape: bf16[1,9,64,64], index: 2, kind: input, shape index: {}]   ;;  %s5545_s3 = inlined_call_operand.vmem [shape: bf16[1,64,64], index: 3, kind: input, shape index: {}]   ;;  %s5546_s4 = inlined_call_operand.vmem [shape: f32[1,4,64], index: 4, kind: input, shape index: {}]   ;;  %s5547_s5 = inlined_call_operand.vmem [shape: f32[2,64], index: 5, kind: input, shape index: {}]   ;;  %s5548_s6 = inlined_call_operand.hbm [shape: f32[128,64], index: 6, kind: output, shape index: {}]  }
   0x1   :  { %v3703_v0 = vld [vmem:[%s5543_s1] sm:$0xff]   ;;  %v3704_v1 = vld [vmem:[%s5543_s1 + $0x8] sm:$0xff]   ;;  %v3705_v2 = vld [vmem:[%s5543_s1 + $0x10] sm:$0xff]  }
   0x2   :  { %3299 = vmatprep.subr.bf16.mxu0 %v3703_v0  ;;  %v25_v3 = vld [vmem:[%s5542_s0] sm:$0xff]   ;;  %v3706_v4 = vld [vmem:[%s5543_s1 + $0x18] sm:$0xff]   ;;  %v27_v5 = vld [vmem:[%s5542_s0 + $0x8] sm:$0xff]  }
   0x3   :  { %3300 = vmatpush3.bf16.msra.mxu0 %v3703_v0  ;;  %3307 = vmatprep.mubr.msk.bf16.mxu0 %vm113_vm0, %v25_v3  ;;  %v29_v6 = vld [vmem:[%s5542_s0 + $0x10] sm:$0xff]   ;;  %v31_v7 = vld [vmem:[%s5542_s0 + $0x18] sm:$0xff]   ;;  %v33_v8 = vld [vmem:[%s5542_s0 + $0x20] sm:$0xff]  }
   0x4   :  { %3301 = vmatprep.subr.bf16.mxu0 %v3704_v1  ;;  %v35_v9 = vld [vmem:[%s5542_s0 + $0x28] sm:$0xff]   ;;  %v37_v10 = vld [vmem:[%s5542_s0 + $0x30] sm:$0xff]  }
   0x7   :  { %3302 = vmatpush3.bf16.msra.mxu0 %v3704_v1 }
   0x8   :  { %3303 = vmatprep.subr.bf16.mxu0 %v3705_v2 }
   0xb   :  { %3304 = vmatpush3.bf16.msra.mxu0 %v3705_v2 }
   0xc   :  { %3305 = vmatprep.subr.bf16.mxu0 %v3706_v4 }
   0xf   :  { %3306 = vmatpush3.bf16.msra.mxu0 %v3706_v4 }
  0x12   :  { %3308 = vmatmul.mubr.msk.bf16.vlgmr.msra.gmra.mrb[0].mxu0 %vm113_vm0, %v27_v5 }
  0x13   :  { %3311 = vmatprep.mubr.msk.bf16.mxu0 %vm113_vm0, %v29_v6 }
  0x1a   :  { %3312 = vmatmul.mubr.msk.bf16.gmra.mrb[4].mxu0 %vm113_vm0, %v31_v7 }
  0x1b   :  { %3315 = vmatprep.mubr.msk.bf16.mxu0 %vm113_vm0, %v33_v8 }
  0x1c   :  { %11 = vsyncpa [#allocation3], 0  ;;  %v39_v11 = vld [vmem:[%s5542_s0 + $0x38] sm:$0xff]   ;;  %v3715_v15 = vld [vmem:[%s5544_s2 + $0x20] sm:$0xff]   ;;  %v5549_v40 = vmov 0.0   ;;  %vm529_vm7 = vcmask 1040384  }
  0x1d   :  { %3323 = vmatprep.subr.bf16.mxu0 %v3715_v15  ;;  %v4002_v20 = vld [vmem:[%s5544_s2 + $0x60] sm:$0xff]   ;;  %v3717_v22 = vld [vmem:[%s5544_s2 + $0x28] sm:$0xff]   ;;  %v3719_v31 = vld [vmem:[%s5544_s2 + $0x30] sm:$0xff]   ;;  %2355 = vst.msk [vmem:[#allocation2] sm:$0xff] %vm113_vm0, %v5549_v40 }
  0x1e   :  { %3324 = vmatpush3.bf16.msra.mxu0 %v3715_v15  ;;  %3563 = vmatprep.subr.bf16.mxu1 %v4002_v20  ;;  %v3718_v28 = vld [vmem:[%s5544_s2 + $0x68] sm:$0xff]   ;;  %v4034_v35 = vld [vmem:[%s5544_s2 + $0x70] sm:$0xff]   ;;  %v3721_v36 = vld [vmem:[%s5544_s2 + $0x38] sm:$0xff]   ;;  %2356 = vst.msk [vmem:[#allocation2 + $0x8] sm:$0xff] %vm113_vm0, %v5549_v40 }
  0x1f   :  { %3567 = vmatpush3.bf16.msra.mxu1 %v4002_v20  ;;  %3325 = vmatprep.subr.bf16.mxu0 %v3717_v22  ;;  %v3722_v38 = vld [vmem:[%s5544_s2 + $0x78] sm:$0xff]   ;;  %2357 = vst.msk [vmem:[#allocation2 + $0x10] sm:$0xff] %vm113_vm0, %v5549_v40  ;;  %2358 = vst.msk [vmem:[#allocation2 + $0x18] sm:$0xff] %vm113_vm0, %v5549_v40  ;;  %v4088_v62 = vld [vmem:[%s5544_s2 + $0x80] sm:$0xff]  }
  0x20   :  { %3564 = vmatprep.subr.bf16.mxu1 %v3718_v28  ;;  %2359 = vst.msk [vmem:[#allocation2 + $0x20] sm:$0xff] %vm113_vm0, %v5549_v40  ;;  %2360 = vst.msk [vmem:[#allocation2 + $0x28] sm:$0xff] %vm113_vm0, %v5549_v40 }
  0x21   :  { %2361 = vst.msk [vmem:[#allocation2 + $0x30] sm:$0xff] %vm113_vm0, %v5549_v40  ;;  %2362 = vst.msk [vmem:[#allocation2 + $0x38] sm:$0xff] %vm113_vm0, %v5549_v40 }
  0x22   :  { %3316 = vmatmul.mubr.msk.bf16.gmra.mrb[8].mxu0 %vm113_vm0, %v35_v9  ;;  %2363 = vst.msk [vmem:[#allocation2 + $0x40] sm:$0xff] %vm113_vm0, %v5549_v40  ;;  %2364 = vst.msk [vmem:[#allocation2 + $0x48] sm:$0xff] %vm113_vm0, %v5549_v40  ;;  %v4097_v9 = vld [vmem:[%s5544_s2] sm:$0xff]  }
  0x23   :  { %3319 = vmatprep.mubr.msk.bf16.mxu0 %vm113_vm0, %v37_v10  ;;  %3326 = vmatpush3.bf16.msra.mxu0 %v3717_v22  ;;  %2365 = vst.msk [vmem:[#allocation2 + $0x50] sm:$0xff] %vm113_vm0, %v5549_v40  ;;  %2366 = vst.msk [vmem:[#allocation2 + $0x58] sm:$0xff] %vm113_vm0, %v5549_v40 }
  0x24   :  { %3568 = vmatpush3.bf16.msra.mxu1 %v3718_v28  ;;  %3327 = vmatprep.subr.bf16.mxu0 %v3719_v31  ;;  %2367 = vst.msk [vmem:[#allocation2 + $0x60] sm:$0xff] %vm113_vm0, %v5549_v40  ;;  %2368 = vst.msk [vmem:[#allocation2 + $0x68] sm:$0xff] %vm113_vm0, %v5549_v40 }
  0x25   :  { %3565 = vmatprep.subr.bf16.mxu1 %v4034_v35  ;;  %2369 = vst.msk [vmem:[#allocation2 + $0x70] sm:$0xff] %vm113_vm0, %v5549_v40  ;;  %2370 = vst.msk [vmem:[#allocation2 + $0x78] sm:$0xff] %vm113_vm0, %v5549_v40 }
  0x27   :  { %3328 = vmatpush3.bf16.msra.mxu0 %v3719_v31 }
  0x28   :  { %3329 = vmatprep.subr.bf16.mxu0 %v3721_v36  ;;  %3569 = vmatpush3.bf16.msra.mxu1 %v4034_v35 }
  0x29   :  { %3566 = vmatprep.subr.bf16.mxu1 %v3722_v38 }
  0x2a   :  { %3320 = vmatmul.mubr.msk.bf16.gmra.mrb[12].mxu0 %vm113_vm0, %v39_v11 }
  0x2b   :  { %3330 = vmatpush3.bf16.msra.mxu0 %v3721_v36 }
  0x2c   :  { %3570 = vmatpush3.bf16.msra.mxu1 %v3722_v38  ;;  %3347 = vmatprep.subr.bf16.mxu0 %v4097_v9 }
  0x2d   :  { %3419 = vmatprep.subr.bf16.mxu1 %v4088_v62 }
  0xe5   :  { %v3984_v12 = vpop.f32.mrb[0].mxu0 }
  0xe6   :  { %v3986_v13 = vpop.f32.mrb[1].mxu0  ;;  %v240_v21 = vsel %vm113_vm0, %v3984_v12, 0.0 }
  0xe7   :  { %v3988_v14 = vpop.f32.mrb[2].mxu0  ;;  %v237_v17 = vsel %vm113_vm0, %v3986_v13, 0.0 }
  0xe8   :  { %v3993_v16 = vpop.f32.mrb[3].mxu0  ;;  %v242_v24 = vsel %vm113_vm0, %v3988_v14, 0.0 }
  0xe9   :  { %v238_v18 = vsel %vm113_vm0, %v3993_v16, 0.0 }
  0xea   :  { %v239_v19 = vadd.f32 %v238_v18, %v237_v17 }
  0xec   :  { %v241_v23 = vadd.f32 %v240_v21, %v239_v19 }
  0xed   :  { %v4012_v25 = vpop.f32.mrb[4].mxu0 }
  0xee   :  { %v4015_v26 = vpop.f32.mrb[5].mxu0  ;;  %v243_v27 = vadd.f32 %v242_v24, %v241_v23  ;;  %v248_v39 = vsel %vm113_vm0, %v4012_v25, 0.0 }
  0xef   :  { %v244_v29 = vsel %vm113_vm0, %v4015_v26, 0.0  ;;  %v4022_v30 = vpop.f32.mrb[6].mxu0 }
  0xf0   :  { %v245_v32 = vadd.f32 %v244_v29, %v243_v27  ;;  %v4027_v33 = vpop.f32.mrb[7].mxu0  ;;  %v250_v42 = vsel %vm113_vm0, %v4022_v30, 0.0 }
  0xf1   :  { %v246_v34 = vsel %vm113_vm0, %v4027_v33, 0.0 }
  0xf2   :  { %v247_v37 = vadd.f32 %v246_v34, %v245_v32 }
  0xf4   :  { %v249_v41 = vadd.f32 %v248_v39, %v247_v37 }
  0xf5   :  { %v3317_v43 = vpop.f32.mrb[8].mxu0 }
  0xf6   :  { %v204_v44 = vpop.f32.mrb[9].mxu0  ;;  %v251_v45 = vadd.f32 %v250_v42, %v249_v41  ;;  %v256_v52 = vsel %vm113_vm0, %v3317_v43, 0.0 }
  0xf7   :  { %v252_v46 = vsel %vm113_vm0, %v204_v44, 0.0  ;;  %v3318_v47 = vpop.f32.mrb[10].mxu0 }
  0xf8   :  { %v253_v48 = vadd.f32 %v252_v46, %v251_v45  ;;  %v207_v49 = vpop.f32.mrb[11].mxu0  ;;  %v258_v54 = vsel %vm113_vm0, %v3318_v47, 0.0 }
  0xf9   :  { %v254_v50 = vsel %vm113_vm0, %v207_v49, 0.0 }
  0xfa   :  { %v255_v51 = vadd.f32 %v254_v50, %v253_v48 }
  0xfc   :  { %v257_v53 = vadd.f32 %v256_v52, %v255_v51 }
  0xfd   :  { %v3321_v55 = vpop.f32.mrb[12].mxu0 }
  0xfe   :  { %v220_v56 = vpop.f32.mrb[13].mxu0  ;;  %v259_v57 = vadd.f32 %v258_v54, %v257_v53  ;;  %v264_v1 = vsel %vm113_vm0, %v3321_v55, 0.0 }
  0xff   :  { %v260_v58 = vsel %vm113_vm0, %v220_v56, 0.0  ;;  %v3322_v59 = vpop.f32.mrb[14].mxu0 }
 0x100   :  { %v261_v60 = vadd.f32 %v260_v58, %v259_v57  ;;  %v223_v61 = vpop.f32.mrb[15].mxu0  ;;  %v266_v3 = vsel %vm113_vm0, %v3322_v59, 0.0 }
 0x101   :  { %v262_v63 = vsel %vm113_vm0, %v223_v61, 0.0 }
 0x102   :  { %v263_v0 = vadd.f32 %v262_v63, %v261_v60 }
 0x104   :  { %v265_v2 = vadd.f32 %v264_v1, %v263_v0 }
 0x106   :  { %v267_v4 = vadd.f32 %v266_v3, %v265_v2 }
 0x108   :  { %v268_v5 = vrot.slane %v267_v4, 4 }
 0x10a   :  { %v269_v6 = vadd.f32 %v268_v5, %v267_v4 }
 0x10c   :  { %v270_v7 = vrot.slane %v269_v6, 2 }
 0x10e   :  { %v271_v8 = vadd.f32 %v270_v7, %v269_v6 }
 0x110   :  { %v272_v10 = vrot.slane %v271_v8, 1 }
 0x112   :  { %v273_v11 = vadd.f32 %v272_v10, %v271_v8 }
 0x114   :  { %v274_v15 = vmul.f32 0.0078125, %v273_v11 }
 0x116   :  { %v4101_v17 = vsub.f32 %v3986_v13, %v274_v15  ;;  %v4104_v18 = vsub.f32 %v3993_v16, %v274_v15  ;;  %v4107_v19 = vsub.f32 %v3984_v12, %v274_v15  ;;  %v4110_v21 = vsub.f32 %v3988_v14, %v274_v15 }
 0x117   :  { %v4113_v22 = vsub.f32 %v4015_v26, %v274_v15  ;;  %v4116_v23 = vsub.f32 %v4027_v33, %v274_v15  ;;  %v4119_v24 = vsub.f32 %v4012_v25, %v274_v15  ;;  %v4122_v13 = vsub.f32 %v4022_v30, %v274_v15 }
 0x118   :  { %v4124_v16 = vsub.f32 %v204_v44, %v274_v15  ;;  %v4126_v27 = vsub.f32 %v207_v49, %v274_v15  ;;  %v4128_v12 = vsub.f32 %v3317_v43, %v274_v15  ;;  %v4130_v14 = vsub.f32 %v3318_v47, %v274_v15 }
 0x119   :  { %v4132_v28 = vsub.f32 %v220_v56, %v274_v15  ;;  %v4134_v26 = vsub.f32 %v223_v61, %v274_v15  ;;  %v4136_v29 = vsub.f32 %v3321_v55, %v274_v15  ;;  %v4138_v31 = vsub.f32 %v3322_v59, %v274_v15 }
 0x11a   :  { %v291_v25 = vmul.f32 %v4101_v17, %v4101_v17  ;;  %v292_v30 = vmul.f32 %v4104_v18, %v4104_v18  ;;  %v293_v32 = vmul.f32 %v4107_v19, %v4107_v19  ;;  %v294_v33 = vmul.f32 %v4110_v21, %v4110_v21 }
 0x11b   :  { %v295_v38 = vmul.f32 %v4113_v22, %v4113_v22  ;;  %v296_v42 = vmul.f32 %v4116_v23, %v4116_v23  ;;  %v297_v45 = vmul.f32 %v4119_v24, %v4119_v24  ;;  %v298_v48 = vmul.f32 %v4122_v13, %v4122_v13 }
 0x11c   :  { %v307_v34 = vsel %vm113_vm0, %v291_v25, 0.0  ;;  %v308_v36 = vsel %vm113_vm0, %v292_v30, 0.0  ;;  %v310_v39 = vsel %vm113_vm0, %v293_v32, 0.0  ;;  %v312_v43 = vsel %vm113_vm0, %v294_v33, 0.0 }
 0x11d   :  { %v309_v37 = vadd.f32 %v308_v36, %v307_v34  ;;  %v314_v46 = vsel %vm113_vm0, %v295_v38, 0.0  ;;  %v316_v49 = vsel %vm113_vm0, %v296_v42, 0.0  ;;  %v299_v51 = vmul.f32 %v4124_v16, %v4124_v16 }
 0x11e   :  { %v318_v52 = vsel %vm113_vm0, %v297_v45, 0.0  ;;  %v300_v54 = vmul.f32 %v4126_v27, %v4126_v27  ;;  %v320_v55 = vsel %vm113_vm0, %v298_v48, 0.0  ;;  %v301_v57 = vmul.f32 %v4128_v12, %v4128_v12 }
 0x11f   :  { %v311_v41 = vadd.f32 %v310_v39, %v309_v37  ;;  %v322_v58 = vsel %vm113_vm0, %v299_v51, 0.0  ;;  %v302_v60 = vmul.f32 %v4130_v14, %v4130_v14  ;;  %v303_v0 = vmul.f32 %v4132_v28, %v4132_v28  ;;  %v4199_v51 = vld [vmem:[%s5546_s4 + $0x1] ss:$0 sm:$0xff] }
 0x120   :  { %v324_v61 = vsel %vm113_vm0, %v300_v54, 0.0  ;;  %v326_v1 = vsel %vm113_vm0, %v301_v57, 0.0  ;;  %v304_v3 = vmul.f32 %v4134_v26, %v4134_v26  ;;  %v305_v6 = vmul.f32 %v4136_v29, %v4136_v29 }
 0x121   :  { %v313_v44 = vadd.f32 %v312_v43, %v311_v41  ;;  %v328_v4 = vsel %vm113_vm0, %v302_v60, 0.0  ;;  %v330_v7 = vsel %vm113_vm0, %v303_v0, 0.0  ;;  %v306_v10 = vmul.f32 %v4138_v31, %v4138_v31 }
 0x122   :  { %v332_v11 = vsel %vm113_vm0, %v304_v3, 0.0  ;;  %v334_v25 = vsel %vm113_vm0, %v305_v6, 0.0 }
 0x123   :  { %v315_v47 = vadd.f32 %v314_v46, %v313_v44  ;;  %v336_v32 = vsel %vm113_vm0, %v306_v10, 0.0  ;;  %v348_v44 = vlaneseq  ;;  %v235_v46 = vld [vmem:[%s5546_s4] sm:$0x1] }
 0x125   :  { %v317_v50 = vadd.f32 %v316_v49, %v315_v47  ;;  %v349_v45 = vshrl.u32 %v348_v44, 7 }
 0x127   :  { %v319_v53 = vadd.f32 %v318_v52, %v317_v50  ;;  %v4191_v47 = vsub.s32 0, %v349_v45 }
 0x129   :  { %v321_v56 = vadd.f32 %v320_v55, %v319_v53  ;;  %5554 = vst [vmem:[#allocation5_spill] sm:$0xff] %v4191_v47 }
 0x12b   :  { %v323_v59 = vadd.f32 %v322_v58, %v321_v56 }
 0x12d   :  { %v325_v63 = vadd.f32 %v324_v61, %v323_v59 }
 0x12f   :  { %v327_v2 = vadd.f32 %v326_v1, %v325_v63 }
 0x131   :  { %v329_v5 = vadd.f32 %v328_v4, %v327_v2 }
 0x133   :  { %v331_v8 = vadd.f32 %v330_v7, %v329_v5 }
 0x135   :  { %v333_v15 = vadd.f32 %v332_v11, %v331_v8 }
 0x137   :  { %v335_v30 = vadd.f32 %v334_v25, %v333_v15 }
 0x139   :  { %v337_v33 = vadd.f32 %v336_v32, %v335_v30 }
 0x13b   :  { %v338_v34 = vrot.slane %v337_v33, 4 }
 0x13d   :  { %v339_v36 = vadd.f32 %v338_v34, %v337_v33 }
 0x13f   :  { %v340_v37 = vrot.slane %v339_v36, 2 }
 0x141   :  { %v341_v38 = vadd.f32 %v340_v37, %v339_v36 }
 0x143   :  { %v342_v39 = vrot.slane %v341_v38, 1 }
 0x145   :  { %v343_v41 = vadd.f32 %v342_v39, %v341_v38 }
 0x147   :  { %v344_v42 = vmul.f32 0.0078125, %v343_v41 }
 0x149   :  { %v345_v43 = vadd.f32 1e-05, %v344_v42 }
 0x14b   :  { %3763 = vrsqrt.f32 %v345_v43 }
 0x155   :  { %v3764_v48 = vpop.eup %3763 }
 0x156   :  { %v347_v49 = vmul.f32 %v3764_v48, %v235_v46 }
 0x158   :  { %v4194_v50 = vrot.slane %v347_v49, %v4191_v47 }
 0x15a   :  { %v363_v52 = vmul.f32 %v4194_v50, %v4130_v14  ;;  %v364_v53 = vmul.f32 %v4194_v50, %v4132_v28  ;;  %v365_v54 = vmul.f32 %v4194_v50, %v4134_v26  ;;  %v366_v55 = vmul.f32 %v4194_v50, %v4136_v29 }
 0x15b   :  { %v4211_v56 = vmul.f32 %v4194_v50, %v4138_v31  ;;  %v352_v57 = vmul.f32 %v4194_v50, %v4101_v17  ;;  %v353_v58 = vmul.f32 %v4194_v50, %v4104_v18  ;;  %v354_v14 = vmul.f32 %v4194_v50, %v4107_v19 }
 0x15c   :  { %v4220_v28 = vadd.f32 %v4199_v51, %v365_v54  ;;  %v355_v26 = vmul.f32 %v4194_v50, %v4110_v21  ;;  %v356_v18 = vmul.f32 %v4194_v50, %v4113_v22  ;;  %v360_v2 = vmul.f32 %v4194_v50, %v4124_v16 }
 0x15d   :  { %v4225_v29 = vadd.f32 %v4199_v51, %v352_v57  ;;  %v4228_v31 = vadd.f32 %v4199_v51, %v353_v58  ;;  %v4231_v17 = vadd.f32 %v4199_v51, %v354_v14  ;;  %v361_v22 = vmul.f32 %v4194_v50, %v4126_v27 }
 0x15e   :  { %v417_v19 = vmin.f32 %v4220_v28, 0.0  ;;  %v4240_v63 = vadd.f32 %v4199_v51, %v355_v26  ;;  %v4243_v1 = vadd.f32 %v4199_v51, %v356_v18  ;;  %v4250_v3 = vadd.f32 %v4199_v51, %v364_v53 }
 0x15f   :  { %v404_v59 = vmin.f32 %v4225_v29, 0.0  ;;  %v405_v61 = vmin.f32 %v4228_v31, 0.0  ;;  %v406_v21 = vmin.f32 %v4231_v17, 0.0  ;;  %v4253_v6 = vadd.f32 %v4199_v51, %v366_v55 }
 0x160   :  { %v446_v60 = vmul.f32 1.442695, %v417_v19  ;;  %v407_v7 = vmin.f32 %v4240_v63, 0.0  ;;  %v408_v8 = vmin.f32 %v4243_v1, 0.0  ;;  %v362_v16 = vmul.f32 %v4194_v50, %v4128_v12 }
 0x161   :  { %v420_v0 = vmul.f32 1.442695, %v404_v59  ;;  %v422_v4 = vmul.f32 1.442695, %v405_v61  ;;  %v424_v5 = vmul.f32 1.442695, %v406_v21  ;;  %v4260_v27 = vadd.f32 %v4199_v51, %v360_v2 }
 0x162   :  { %3765 = vpow2.f32 %v446_v60  ;;  %v4263_v10 = vadd.f32 %v4199_v51, %v361_v22  ;;  %v426_v11 = vmul.f32 1.442695, %v407_v7  ;;  %v428_v15 = vmul.f32 1.442695, %v408_v8  ;;  %v3729_v8 = vld [vmem:[%s5544_s2 + $0x8] sm:$0xff]  }
 0x163   :  { %3767 = vpow2.f32 %v420_v0  ;;  %v4266_v25 = vadd.f32 %v4199_v51, %v363_v52  ;;  %v416_v30 = vmin.f32 %v4250_v3, 0.0  ;;  %v4270_v32 = vadd.f32 %v4199_v51, %v362_v16 }
 0x164   :  { %3769 = vpow2.f32 %v422_v4  ;;  %v412_v33 = vmin.f32 %v4260_v27, 0.0  ;;  %v4274_v12 = vrot.slane %v5549_v40, 7  ;;  %vm401_vm1 = vcmp.gt.f32.partialorder %v4220_v28, 0.0 }
 0x165   :  { %3771 = vpow2.f32 %v424_v5  ;;  %v413_v34 = vmin.f32 %v4263_v10, 0.0  ;;  %v415_v36 = vmin.f32 %v4266_v25, 0.0  ;;  %v418_v37 = vmin.f32 %v4253_v6, 0.0 }
 0x166   :  { %3773 = vpow2.f32 %v426_v11  ;;  %v414_v38 = vmin.f32 %v4270_v32, 0.0  ;;  %v436_v39 = vmul.f32 1.442695, %v412_v33  ;;  %vm388_vm2 = vcmp.gt.f32.partialorder %v4225_v29, 0.0 }
 0x167   :  { %3775 = vpow2.f32 %v428_v15  ;;  %v438_v41 = vmul.f32 1.442695, %v413_v34  ;;  %v442_v42 = vmul.f32 1.442695, %v415_v36  ;;  %v357_v43 = vmul.f32 %v4194_v50, %v4116_v23 }
 0x168   :  { %3777 = vpow2.f32 %v436_v39  ;;  %v440_v44 = vmul.f32 1.442695, %v414_v38  ;;  %v444_v45 = vmul.f32 1.442695, %v416_v30  ;;  %v358_v46 = vmul.f32 %v4194_v50, %v4119_v24 }
 0x169   :  { %vm389_vm3 = vcmp.gt.f32.partialorder %v4228_v31, 0.0  ;;  %vm390_vm4 = vcmp.gt.f32.partialorder %v4231_v17, 0.0  ;;  %3779 = vpow2.f32 %v438_v41  ;;  %v4289_v48 = vadd.f32 %v4199_v51, %v357_v43 }
 0x16a   :  { %vm391_vm5 = vcmp.gt.f32.partialorder %v4240_v63, 0.0  ;;  %vm392_vm6 = vcmp.gt.f32.partialorder %v4243_v1, 0.0  ;;  %3781 = vpow2.f32 %v440_v44  ;;  %v4294_v23 = vadd.f32 %v4199_v51, %v358_v46 }
 0x16b   :  { %3783 = vpow2.f32 %v442_v42  ;;  %v409_v53 = vmin.f32 %v4289_v48, 0.0  ;;  %v4299_v54 = vadd.f32 %v4199_v51, %v4211_v56  ;;  %vm396_vm8 = vcmp.gt.f32.partialorder %v4260_v27, 0.0  ;;  %v3730_v42 = vld [vmem:[%s5544_s2 + $0x10] sm:$0xff]  }
 0x16c   :  { %v3766_v49 = vpop.eup %3765  ;;  %3785 = vpow2.f32 %v444_v45  ;;  %v410_v58 = vmin.f32 %v4294_v23, 0.0  ;;  %vm397_vm9 = vcmp.gt.f32.partialorder %v4263_v10, 0.0  ;;  %v448_v59 = vmul.f32 1.442695, %v418_v37 }
 0x16d   :  { %v3768_v52 = vpop.eup %3767  ;;  %v2946_v24 = vadd.f32 -1.0, %v3766_v49  ;;  %v430_v19 = vmul.f32 1.442695, %v409_v53  ;;  %vm398_vm10 = vcmp.gt.f32.partialorder %v4270_v32, 0.0  ;;  %v359_v21 = vmul.f32 %v4194_v50, %v4122_v13 }
 0x16e   :  { %v3770_v55 = vpop.eup %3769  ;;  %v2933_v57 = vadd.f32 -1.0, %v3768_v52  ;;  %v432_v61 = vmul.f32 1.442695, %v410_v58  ;;  %vm399_vm11 = vcmp.gt.f32.partialorder %v4266_v25, 0.0  ;;  %vm400_vm12 = vcmp.gt.f32.partialorder %v4250_v3, 0.0 }
 0x16f   :  { %v3772_v14 = vpop.eup %3771  ;;  %v4306_v26 = vsel %vm401_vm1, %v4220_v28, %v2946_v24  ;;  %v2934_v18 = vadd.f32 -1.0, %v3770_v55  ;;  %3787 = vpow2.f32 %v430_v19  ;;  %v4349_v15 = vadd.f32 %v4199_v51, %v359_v21 }
 0x170   :  { %v4312_v56 = vsel %vm388_vm2, %v4225_v29, %v2933_v57  ;;  %v2935_v60 = vadd.f32 -1.0, %v3772_v14  ;;  %v3774_v0 = vpop.eup %3773  ;;  %v419_v29 = vmin.f32 %v4299_v54, 0.0  ;;  %v512_v50 = vrot.slane %v4306_v26, 7 }
 0x171   :  { %v561_v28 = vpack.c.bf16 %v4312_v56, %v5549_v40  ;;  %v4322_v2 = vsel %vm389_vm3, %v4228_v31, %v2934_v18  ;;  %v3776_v22 = vpop.eup %3775  ;;  %v2936_v13 = vadd.f32 -1.0, %v3774_v0  ;;  %3789 = vpow2.f32 %v432_v61 }
 0x172   :  { %v4329_v4 = vsel %vm390_vm4, %v4231_v17, %v2935_v60  ;;  %v2937_v5 = vadd.f32 -1.0, %v3776_v22  ;;  %3791 = vpow2.f32 %v448_v59  ;;  %v450_v7 = vmul.f32 1.442695, %v419_v29  ;;  %v3778_v16 = vpop.eup %3777  ;;  %v3732_v59 = vld [vmem:[%s5544_s2 + $0x18] sm:$0xff]  }
 0x173   :  { %3331 = vmatprep.mubr.msk.bf16.mxu0 %vm113_vm0, %v561_v28  ;;  %v4335_v31 = vpack.c.bf16 %v4329_v4, %v4322_v2  ;;  %v4343_v17 = vsel %vm391_vm5, %v4240_v63, %v2936_v13  ;;  %v1278_v11 = vpack.c.bf16 %v4322_v2, %v4312_v56  ;;  %v3780_v30 = vpop.eup %3779  ;;  %v2941_v34 = vadd.f32 -1.0, %v3778_v16 }
 0x174   :  { %v4356_v33 = vsel %vm392_vm6, %v4243_v1, %v2937_v5  ;;  %v1279_v63 = vpack.c.bf16 %v4343_v17, %v4329_v4  ;;  %3793 = vpow2.f32 %v450_v7  ;;  %v3782_v36 = vpop.eup %3781  ;;  %v2942_v51 = vadd.f32 -1.0, %v3780_v30 }
 0x175   :  { %3332 = vmatmul.mubr.msk.bf16.vlgmr.msra.gmra.mrb[16].mxu0 %vm113_vm0, %v4335_v31  ;;  %v4362_v37 = vpack.c.bf16 %v4356_v33, %v4343_v17  ;;  %vm393_vm13 = vcmp.gt.f32.partialorder %v4289_v48, 0.0  ;;  %vm394_vm14 = vcmp.gt.f32.partialorder %v4294_v23, 0.0  ;;  %v3784_v38 = vpop.eup %3783  ;;  %v2943_v1 = vadd.f32 -1.0, %v3782_v36 }
 0x176   :  { %3348 = vmatpush3.bf16.msra.mxu0 %v4097_v9  ;;  %v4370_v39 = vsel %vm396_vm8, %v4260_v27, %v2941_v34  ;;  %v4373_v41 = vsel %vm529_vm7, 0.0, %v512_v50  ;;  %vm402_vm15 = vcmp.gt.f32.partialorder %v4253_v6, 0.0  ;;  %v411_v43 = vmin.f32 %v4349_v15, 0.0  ;;  %v3786_v9 = vpop.eup %3785 }
 0x177   :  { %3349 = vmatprep.subr.bf16.mxu0 %v3729_v8  ;;  %3335 = vmatprep.mubr.msk.bf16.mxu0 %vm113_vm0, %v4362_v37  ;;  %v2944_v44 = vadd.f32 -1.0, %v3784_v38  ;;  %v4385_v27 = vsel %vm397_vm9, %v4263_v10, %v2942_v51  ;;  %v507_v45 = vrot.slane %v4370_v39, 7  ;;  %v500_v46 = vrot.slane %v4312_v56, 7 }
 0x178   :  { %v4392_v49 = vsel %vm398_vm10, %v4270_v32, %v2943_v1  ;;  %v508_v52 = vrot.slane %v4385_v27, 7  ;;  %v2945_v24 = vadd.f32 -1.0, %v3786_v9  ;;  %v565_v53 = vpack.c.bf16 %v4370_v39, %v5549_v40 }
 0x179   :  { %vm403_vm1 = vcmp.gt.f32.partialorder %v4299_v54, 0.0  ;;  %v4401_v10 = vsel %vm399_vm11, %v4266_v25, %v2944_v44  ;;  %v509_v55 = vrot.slane %v4392_v49, 7  ;;  %v4405_v57 = vsel %vm529_vm7, 0.0, %v507_v45  ;;  %v3788_v58 = vpop.eup %3787 }
 0x17a   :  { %v4409_v32 = vpack.c.bf16 %v4392_v49, %v4385_v27  ;;  %3350 = vmatpush3.bf16.msra.mxu0 %v3729_v8  ;;  %v510_v14 = vrot.slane %v4401_v10, 7  ;;  %v539_v18 = vsel %vm529_vm7, 0.0, %v508_v52  ;;  %v4416_v25 = vsel %vm400_vm12, %v4250_v3, %v2945_v24  ;;  %v3724_v8 = vld [vmem:[%s5544_s2 + $0x88] sm:$0xff]  }
 0x17b   :  { %3351 = vmatprep.subr.bf16.mxu0 %v3730_v42  ;;  %v434_v19 = vmul.f32 1.442695, %v411_v43  ;;  %v3790_v60 = vpop.eup %3789  ;;  %v540_v61 = vsel %vm529_vm7, 0.0, %v509_v55  ;;  %v1104_v21 = vpack.c.bf16 %v539_v18, %v4405_v57  ;;  %v511_v0 = vrot.slane %v4416_v25, 7  ;;  %v4467_v43 = vld [vmem:[%s5544_s2 + $0x40] sm:$0xff]  }
 0x17c   :  { %v2938_v28 = vadd.f32 -1.0, %v3788_v58  ;;  %v3792_v29 = vpop.eup %3791  ;;  %v4425_v22 = vsel %vm529_vm7, 0.0, %v510_v14  ;;  %v4427_v3 = vpack.c.bf16 %v540_v61, %v539_v18  ;;  %v2939_v13 = vadd.f32 -1.0, %v3790_v60 }
 0x17d   :  { %v4431_v50 = vpack.c.bf16 %v4416_v25, %v4401_v10  ;;  %v1105_v5 = vpack.c.bf16 %v4425_v22, %v540_v61  ;;  %3411 = vmatprep.mubr.msk.bf16.mxu1 %vm113_vm0, %v1104_v21  ;;  %v542_v7 = vsel %vm529_vm7, 0.0, %v511_v0  ;;  %v2947_v30 = vadd.f32 -1.0, %v3792_v29 }
 0x17e   :  { %v4442_v16 = vsel %vm393_vm13, %v4289_v48, %v2938_v28  ;;  %3352 = vmatpush3.bf16.msra.mxu0 %v3730_v42  ;;  %v3794_v34 = vpop.eup %3793  ;;  %v1106_v36 = vpack.c.bf16 %v4373_v41, %v542_v7  ;;  %v4448_v51 = vsel %vm394_vm14, %v4294_v23, %v2939_v13  ;;  %3795 = vpow2.f32 %v434_v19 }
 0x17f   :  { %v1280_v38 = vpack.c.bf16 %v4442_v16, %v4356_v33  ;;  %3353 = vmatprep.subr.bf16.mxu0 %v3732_v59  ;;  %3412 = vmatmul.mubr.msk.bf16.vlgmr.msra.gmra.mrb[0].mxu1 %vm113_vm0, %v1105_v5  ;;  %v4455_v48 = vpack.c.bf16 %v4448_v51, %v4442_v16  ;;  %v2948_v1 = vadd.f32 -1.0, %v3794_v34  ;;  %v4460_v42 = vsel %vm402_vm15, %v4253_v6, %v2947_v30  ;;  %v3726_v5 = vld [vmem:[%s5544_s2 + $0x98] sm:$0xff]  }
 0x180   :  { %3420 = vmatpush3.bf16.msra.mxu1 %v4088_v62  ;;  %3415 = vmatprep.mubr.msk.bf16.mxu1 %vm113_vm0, %v1106_v36  ;;  %v513_v9 = vrot.slane %v4460_v42, 7  ;;  %v4474_v44 = vpack.c.bf16 %v4460_v42, %v4306_v26  ;;  %v501_v6 = vrot.slane %v4322_v2, 7  ;;  %v502_v45 = vrot.slane %v4329_v4, 7  ;;  %v3725_v62 = vld [vmem:[%s5544_s2 + $0x90] sm:$0xff]  }
 0x181   :  { %3421 = vmatprep.subr.bf16.mxu1 %v3724_v8  ;;  %3336 = vmatmul.mubr.msk.bf16.gmra.mrb[20].mxu0 %vm113_vm0, %v4455_v48  ;;  %v4486_v52 = vsel %vm403_vm1, %v4299_v54, %v2948_v1  ;;  %v503_v24 = vrot.slane %v4343_v17, 7  ;;  %v504_v55 = vrot.slane %v4356_v33, 7  ;;  %vm898_vm2 = vcmask 1046528  }
 0x182   :  { %5555 = vst [vmem:[#allocation6_spill] sm:$0xff] %v4474_v44  ;;  %3339 = vmatprep.mubr.msk.bf16.mxu0 %vm113_vm0, %v565_v53  ;;  %v544_v14 = vsel %vm529_vm7, 0.0, %v513_v9  ;;  %v1095_v18 = vrot.slane %v4486_v52, 7  ;;  %3354 = vmatpush3.bf16.msra.mxu0 %v3732_v59  ;;  %v4496_v19 = vsel %vm529_vm7, 0.0, %v501_v6  ;;  %v4499_v54 = vsel %vm529_vm7, 0.0, %v502_v45 }
 0x183   :  { %v4503_v60 = vpack.c.bf16 %v4499_v54, %v4496_v19  ;;  %v4506_v61 = vsel %vm529_vm7, 0.0, %v503_v24  ;;  %v4509_v53 = vsel %vm529_vm7, 0.0, %v504_v55  ;;  %3371 = vmatprep.subr.bf16.mxu0 %v4467_v43  ;;  %v4525_v29 = vsel %vm529_vm7, 0.0, %v4274_v12 }
 0x184   :  { %3422 = vmatpush3.bf16.msra.mxu1 %v3724_v8  ;;  %v4515_v59 = vsel %vm529_vm7, 0.0, %v1095_v18  ;;  %v4519_v0 = vpack.c.bf16 %v4509_v53, %v4506_v61  ;;  %v869_v30 = vrot.slane %v4312_v56, 1  ;;  %v870_v34 = vrot.slane %v4322_v2, 1  ;;  %v3728_v56 = vld [vmem:[%s5544_s2 + $0xa0] sm:$0xff]  }
 0x185   :  { %3423 = vmatprep.subr.bf16.mxu1 %v3725_v62  ;;  %v1107_v13 = vpack.c.bf16 %v4515_v59, %v544_v14  ;;  %v871_v36 = vrot.slane %v4329_v4, 1  ;;  %v872_v1 = vrot.slane %v4343_v17, 1  ;;  %v868_v12 = vrot.slane %v5549_v40, 1  ;;  %v3736_v8 = vld [vmem:[%s5544_s2 + $0xc0] sm:$0xff]  }
 0x186   :  { %v4542_v9 = vsel %vm529_vm7, 0.0, %v500_v46  ;;  %v4545_v6 = vsel %vm898_vm2, %v869_v30, 0.0  ;;  %v4548_v45 = vpack.c.bf16 %v542_v7, %v4425_v22  ;;  %v873_v24 = vrot.slane %v4356_v33, 1  ;;  %v3733_v33 = vld [vmem:[%s5544_s2 + $0xb0] sm:$0xff]  }
 0x187   :  { %3416 = vmatmul.mubr.msk.bf16.gmra.mrb[4].mxu1 %vm113_vm0, %v1107_v13  ;;  %vm395_vm3 = vcmp.gt.f32.partialorder %v4349_v15, 0.0  ;;  %v4557_v46 = vsel %vm898_vm2, %v870_v34, 0.0  ;;  %v4560_v18 = vsel %vm898_vm2, %v871_v36, 0.0  ;;  %v4563_v22 = vsel %vm898_vm2, %v872_v1, 0.0 }
 0x188   :  { %v3796_v55 = vpop.eup %3795  ;;  %3424 = vmatpush3.bf16.msra.mxu1 %v3725_v62  ;;  %3427 = vmatprep.mubr.msk.bf16.mxu1 %vm113_vm0, %v1278_v11  ;;  %v4572_v11 = vpack.c.bf16 %v4560_v18, %v4557_v46  ;;  %v505_v13 = vrot.slane %v4442_v16, 7  ;;  %v874_v30 = vrot.slane %v4442_v16, 1  ;;  %v4583_v34 = vsel %vm898_vm2, %v873_v24, 0.0 }
 0x189   :  { %3425 = vmatprep.subr.bf16.mxu1 %v3726_v5  ;;  %3340 = vmatmul.mubr.msk.bf16.gmra.mrb[24].mxu0 %vm113_vm0, %v4409_v32  ;;  %v2940_v2 = vadd.f32 -1.0, %v3796_v55  ;;  %v4586_v36 = vpack.c.bf16 %v544_v14, %v4373_v41  ;;  %v506_v55 = vrot.slane %v4448_v51, 7  ;;  %v876_v40 = vrot.slane %v4370_v39, 1 }
 0x18a   :  { %3343 = vmatprep.mubr.msk.bf16.mxu0 %vm113_vm0, %v4431_v50  ;;  %v877_v28 = vrot.slane %v4385_v27, 1  ;;  %v4597_v62 = vsel %vm898_vm2, %v874_v30, 0.0  ;;  %v4602_v41 = vpack.c.bf16 %v4583_v34, %v4563_v22  ;;  %v545_v7 = vpack.c.bf16 %v4542_v9, %v4525_v29 }
 0x18b   :  { %v4591_v1 = vsel %vm395_vm3, %v4349_v15, %v2940_v2  ;;  %v3731_v15 = vld [vmem:[%s5544_s2 + $0xa8] sm:$0xff]   ;;  %v4610_v2 = vsel %vm898_vm2, %v868_v12, 0.0  ;;  %v878_v21 = vrot.slane %v4392_v49, 1  ;;  %v879_v58 = vrot.slane %v4401_v10, 1 }
 0x18c   :  { %3426 = vmatpush3.bf16.msra.mxu1 %v3726_v5  ;;  %v1456_v24 = vrot.slane %v4591_v1, 1  ;;  %v4613_v5 = vsel %vm898_vm2, %v876_v40, 0.0  ;;  %v4616_v30 = vsel %vm898_vm2, %v877_v28, 0.0  ;;  %v4629_v40 = vsel %vm529_vm7, 0.0, %v505_v13 }
 0x18d   :  { %3443 = vmatprep.subr.bf16.mxu1 %v3728_v56  ;;  %v4632_v28 = vsel %vm529_vm7, 0.0, %v506_v55  ;;  %v880_v12 = vrot.slane %v4416_v25, 1  ;;  %v881_v14 = vrot.slane %v4306_v26, 1  ;;  %v4644_v17 = vsel %vm898_vm2, %v878_v21, 0.0 }
 0x18e   :  { %v4641_v4 = vsel %vm898_vm2, %v1456_v24, 0.0  ;;  %v882_v13 = vrot.slane %v4460_v42, 1  ;;  %v4672_v24 = vpack.c.bf16 %v4644_v17, %v4616_v30  ;;  %v1281_v23 = vpack.c.bf16 %v4591_v1, %v4448_v51 }
 0x18f   :  { %3428 = vmatmul.mubr.msk.bf16.vlgmr.msra.gmra.mrb[8].mxu1 %vm113_vm0, %v1279_v63  ;;  %v4647_v63 = vsel %vm898_vm2, %v879_v58, 0.0  ;;  %v4661_v21 = vsel %vm898_vm2, %v881_v14, 0.0  ;;  %v1457_v58 = vrot.slane %v4486_v52, 1 }
 0x190   :  { %3444 = vmatpush3.bf16.msra.mxu1 %v3728_v56  ;;  %3431 = vmatprep.mubr.msk.bf16.mxu1 %vm113_vm0, %v1280_v38  ;;  %v4658_v38 = vsel %vm898_vm2, %v880_v12, 0.0  ;;  %v4668_v55 = vsel %vm898_vm2, %v882_v13, 0.0  ;;  %v1094_v13 = vrot.slane %v4591_v1, 7  ;;  %v3734_v56 = vld [vmem:[%s5544_s2 + $0xb8] sm:$0xff]  }
 0x191   :  { %3344 = vmatmul.mubr.msk.bf16.gmra.mrb[28].mxu0 %vm113_vm0, %v4474_v44  ;;  %3445 = vmatprep.subr.bf16.mxu1 %v3731_v15  ;;  %v4676_v12 = vpack.c.bf16 %v4658_v38, %v4647_v63  ;;  %v4679_v14 = vsel %vm898_vm2, %v1457_v58, 0.0  ;;  %v3737_v44 = vld [vmem:[%s5544_s2 + $0x48] sm:$0xff]  }
 0x192   :  { %3355 = vmatprep.mubr.msk.bf16.mxu0 %vm113_vm0, %v545_v7  ;;  %v4683_v7 = vpack.c.bf16 %v4668_v55, %v4661_v21  ;;  %v4700_v47 = vsel %vm529_vm7, 0.0, %v1094_v13  ;;  %v5556_v13 = vpack.c.bf16 %v4385_v27, %v4370_v39  ;;  %v3738_v39 = vld [vmem:[%s5544_s2 + $0x50] sm:$0xff]   ;;  %v5557_v27 = vpack.c.bf16 %v4401_v10, %v4392_v49  ;;  %v3739_v10 = vld [vmem:[%s5544_s2 + $0xc8] sm:$0xff]  }
 0x193   :  { %v1640_v58 = vpack.c.bf16 %v4525_v29, %v4700_v47  ;;  %v1103_v16 = vpack.c.bf16 %v4700_v47, %v4632_v28  ;;  %v5559_v49 = vpack.c.bf16 %v4486_v52, %v4460_v42  ;;  %v914_v42 = vpack.c.bf16 %v4545_v6, %v4610_v2  ;;  %v3749_v47 = vld [vmem:[%s5544_s2 + $0x110] sm:$0xff]  }
 0x194   :  { %3446 = vmatpush3.bf16.msra.mxu1 %v3731_v15  ;;  %v1948_v15 = vpack.c.bf16 %v4610_v2, %v4641_v4 }
 0x195   :  { %3447 = vmatprep.subr.bf16.mxu1 %v3733_v33 }
 0x197   :  { %3432 = vmatmul.mubr.msk.bf16.gmra.mrb[12].mxu1 %vm113_vm0, %v1281_v23  ;;  %v4735_v23 = vpack.c.bf16 %v4632_v28, %v4629_v40 }
 0x198   :  { %3435 = vmatprep.mubr.msk.bf16.mxu1 %vm113_vm0, %v5556_v13  ;;  %3448 = vmatpush3.bf16.msra.mxu1 %v3733_v33  ;;  %v549_v33 = vpack.c.bf16 %v4405_v57, %v4525_v29  ;;  %v875_v57 = vrot.slane %v4448_v51, 1  ;;  %v3741_v51 = vld [vmem:[%s5544_s2 + $0xd0] sm:$0xff]  }
 0x199   :  { %3356 = vmatmul.mubr.msk.bf16.vlgmr.msra.gmra.mrb[16].mxu0 %vm113_vm0, %v4503_v60  ;;  %3449 = vmatprep.subr.bf16.mxu1 %v3734_v56 }
 0x19a   :  { %3359 = vmatprep.mubr.msk.bf16.mxu0 %vm113_vm0, %v4519_v0  ;;  %3372 = vmatpush3.bf16.msra.mxu0 %v4467_v43  ;;  %v3740_v43 = vld [vmem:[%s5544_s2 + $0x58] sm:$0xff]  }
 0x19b   :  { %3373 = vmatprep.subr.bf16.mxu0 %v3737_v44 }
 0x19c   :  { %3450 = vmatpush3.bf16.msra.mxu1 %v3734_v56  ;;  %v5564_v56 = vpack.c.bf16 %v4647_v63, %v4644_v17  ;;  %v3867_v17 = vld [vmem:[%s5544_s2 + $0x70] sm:$0xff]   ;;  %v5567_v63 = vpack.c.bf16 %v4496_v19, %v4542_v9  ;;  %v5568_v19 = vpack.c.bf16 %v4506_v61, %v4499_v54  ;;  %v3747_v9 = vld [vmem:[%s5544_s2 + $0x100] sm:$0xff]   ;;  %v3748_v54 = vld [vmem:[%s5544_s2 + $0x108] sm:$0xff]   ;;  %v5571_v61 = vmov 0.0  }
 0x19d   :  { %3467 = vmatprep.subr.bf16.mxu1 %v3736_v8 }
 0x19e   :  { %3374 = vmatpush3.bf16.msra.mxu0 %v3737_v44  ;;  %v5558_v44 = vpack.c.bf16 %v4306_v26, %v4416_v25  ;;  %v5560_v26 = vpack.c.bf16 %v4557_v46, %v4545_v6  ;;  %v5562_v25 = vpack.c.bf16 %v4597_v62, %v4583_v34  ;;  %v3742_v6 = vld [vmem:[%s5544_s2 + $0xd8] sm:$0xff]   ;;  %v3865_v34 = vld [vmem:[%s5544_s2 + $0x60] sm:$0xff]  }
 0x19f   :  { %3436 = vmatmul.mubr.msk.bf16.gmra.mrb[0].mxu1 %vm113_vm0, %v5557_v27  ;;  %3375 = vmatprep.subr.bf16.mxu0 %v3738_v39  ;;  %v918_v27 = vpack.c.bf16 %v4613_v5, %v4610_v2 }
 0x1a0   :  { %3439 = vmatprep.mubr.msk.bf16.mxu1 %vm113_vm0, %v5558_v44 }
 0x1a1   :  { %3360 = vmatmul.mubr.msk.bf16.gmra.mrb[20].mxu0 %vm113_vm0, %v4735_v23 }
 0x1a2   :  { %3363 = vmatprep.mubr.msk.bf16.mxu0 %vm113_vm0, %v549_v33  ;;  %3376 = vmatpush3.bf16.msra.mxu0 %v3738_v39  ;;  %v5565_v39 = vpack.c.bf16 %v4661_v21, %v4658_v38  ;;  %v5569_v38 = vpack.c.bf16 %v4629_v40, %v4509_v53  ;;  %v3750_v53 = vld [vmem:[%s5544_s2 + $0x118] sm:$0xff]  }
 0x1a3   :  { %3377 = vmatprep.subr.bf16.mxu0 %v3740_v43 }
 0x1a6   :  { %3378 = vmatpush3.bf16.msra.mxu0 %v3740_v43 }
 0x1a7   :  { %3440 = vmatmul.mubr.msk.bf16.gmra.mrb[4].mxu1 %vm113_vm0, %v5559_v49  ;;  %3395 = vmatprep.subr.bf16.mxu0 %v4002_v20  ;;  %v5561_v20 = vpack.c.bf16 %v4563_v22, %v4560_v18  ;;  %v5563_v18 = vpack.c.bf16 %v4616_v30, %v4613_v5  ;;  %v3743_v22 = vld [vmem:[%s5544_s2 + $0xe0] sm:$0xff]   ;;  %v3866_v30 = vld [vmem:[%s5544_s2 + $0x68] sm:$0xff]   ;;  %v3753_v49 = vld [vmem:[%s5545_s3 + $0x10] sm:$0xff]  }
 0x1a8   :  { %3451 = vmatprep.mubr.msk.bf16.mxu1 %vm113_vm0, %v5560_v26  ;;  %v3744_v5 = vld [vmem:[%s5544_s2 + $0xe8] sm:$0xff]  }
 0x1a9   :  { %3364 = vmatmul.mubr.msk.bf16.gmra.mrb[24].mxu0 %vm113_vm0, %v4427_v3 }
 0x1aa   :  { %3367 = vmatprep.mubr.msk.bf16.mxu0 %vm113_vm0, %v4548_v45 }
 0x1af   :  { %3452 = vmatmul.mubr.msk.bf16.vlgmr.msra.gmra.mrb[8].mxu1 %vm113_vm0, %v5561_v20 }
 0x1b0   :  { %3468 = vmatpush3.bf16.msra.mxu1 %v3736_v8  ;;  %3455 = vmatprep.mubr.msk.bf16.mxu1 %vm113_vm0, %v5562_v25  ;;  %v906_v8 = vsel %vm898_vm2, %v875_v57, 0.0 }
 0x1b1   :  { %3368 = vmatmul.mubr.msk.bf16.gmra.mrb[28].mxu0 %vm113_vm0, %v4586_v36  ;;  %3469 = vmatprep.subr.bf16.mxu1 %v3739_v10  ;;  %v1465_v46 = vpack.c.bf16 %v4641_v4, %v906_v8  ;;  %v917_v13 = vpack.c.bf16 %v906_v8, %v4597_v62  ;;  %v5566_v62 = vpack.c.bf16 %v4679_v14, %v4668_v55 }
 0x1b2   :  { %3379 = vmatprep.mubr.msk.bf16.mxu0 %vm113_vm0, %v914_v42 }
 0x1b4   :  { %3470 = vmatpush3.bf16.msra.mxu1 %v3739_v10 }
 0x1b5   :  { %3471 = vmatprep.subr.bf16.mxu1 %v3741_v51 }
 0x1b7   :  { %3456 = vmatmul.mubr.msk.bf16.gmra.mrb[12].mxu1 %vm113_vm0, %v1465_v46  ;;  %v3754_v46 = vld [vmem:[%s5545_s3 + $0x18] sm:$0xff]  }
 0x1b8   :  { %3459 = vmatprep.mubr.msk.bf16.mxu1 %vm113_vm0, %v5563_v18  ;;  %3472 = vmatpush3.bf16.msra.mxu1 %v3741_v51 }
 0x1b9   :  { %3380 = vmatmul.mubr.msk.bf16.vlgmr.msra.gmra.mrb[16].mxu0 %vm113_vm0, %v4572_v11  ;;  %3473 = vmatprep.subr.bf16.mxu1 %v3742_v6 }
 0x1ba   :  { %3383 = vmatprep.mubr.msk.bf16.mxu0 %vm113_vm0, %v4602_v41  ;;  %3396 = vmatpush3.bf16.msra.mxu0 %v3865_v34 }
 0x1bb   :  { %3397 = vmatprep.subr.bf16.mxu0 %v3866_v30 }
 0x1bc   :  { %3474 = vmatpush3.bf16.msra.mxu1 %v3742_v6 }
 0x1bd   :  { %3491 = vmatprep.subr.bf16.mxu1 %v3743_v22 }
 0x1be   :  { %3398 = vmatpush3.bf16.msra.mxu0 %v3866_v30 }
 0x1bf   :  { %3460 = vmatmul.mubr.msk.bf16.gmra.mrb[0].mxu1 %vm113_vm0, %v5564_v56  ;;  %3399 = vmatprep.subr.bf16.mxu0 %v4034_v35  ;;  %v3868_v35 = vld [vmem:[%s5544_s2 + $0x78] sm:$0xff]  }
 0x1c0   :  { %3463 = vmatprep.mubr.msk.bf16.mxu1 %vm113_vm0, %v5565_v39 }
 0x1c1   :  { %3384 = vmatmul.mubr.msk.bf16.gmra.mrb[20].mxu0 %vm113_vm0, %v917_v13 }
 0x1c2   :  { %3387 = vmatprep.mubr.msk.bf16.mxu0 %vm113_vm0, %v918_v27  ;;  %3400 = vmatpush3.bf16.msra.mxu0 %v3867_v17 }
 0x1c3   :  { %3401 = vmatprep.subr.bf16.mxu0 %v3868_v35 }
 0x1c6   :  { %3402 = vmatpush3.bf16.msra.mxu0 %v3868_v35 }
 0x1c7   :  { %3464 = vmatmul.mubr.msk.bf16.gmra.mrb[4].mxu1 %vm113_vm0, %v5566_v62 }
 0x1c8   :  { %3475 = vmatprep.mubr.msk.bf16.mxu1 %vm113_vm0, %v4503_v60  ;;  %v3745_v60 = vld [vmem:[%s5544_s2 + $0xf0] sm:$0xff]  }
 0x1c9   :  { %3388 = vmatmul.mubr.msk.bf16.gmra.mrb[24].mxu0 %vm113_vm0, %v4672_v24 }
 0x1ca   :  { %3391 = vmatprep.mubr.msk.bf16.mxu0 %vm113_vm0, %v4676_v12 }
 0x1cf   :  { %3476 = vmatmul.mubr.msk.bf16.vlgmr.msra.gmra.mrb[8].mxu1 %vm113_vm0, %v4519_v0  ;;  %v3746_v0 = vld [vmem:[%s5544_s2 + $0xf8] sm:$0xff]  }
 0x1d0   :  { %3492 = vmatpush3.bf16.msra.mxu1 %v3743_v22  ;;  %3479 = vmatprep.mubr.msk.bf16.mxu1 %vm113_vm0, %v4735_v23 }
 0x1d1   :  { %3392 = vmatmul.mubr.msk.bf16.gmra.mrb[28].mxu0 %vm113_vm0, %v4683_v7  ;;  %3493 = vmatprep.subr.bf16.mxu1 %v3744_v5 }
 0x1d2   :  { %3403 = vmatprep.mubr.msk.bf16.mxu0 %vm113_vm0, %v5567_v63 }
 0x1d4   :  { %3494 = vmatpush3.bf16.msra.mxu1 %v3744_v5 }
 0x1d5   :  { %3495 = vmatprep.subr.bf16.mxu1 %v3745_v60 }
 0x1d7   :  { %3480 = vmatmul.mubr.msk.bf16.gmra.mrb[12].mxu1 %vm113_vm0, %v1640_v58  ;;  %v3752_v58 = vld [vmem:[%s5545_s3 + $0x8] sm:$0xff]  }
 0x1d8   :  { %3483 = vmatprep.mubr.msk.bf16.mxu1 %vm113_vm0, %v4427_v3  ;;  %3496 = vmatpush3.bf16.msra.mxu1 %v3745_v60  ;;  %v5570_v3 = vpack.c.bf16 %v4525_v29, %v4515_v59 }
 0x1d9   :  { %3404 = vmatmul.mubr.msk.bf16.vlgmr.msra.gmra.mrb[16].mxu0 %vm113_vm0, %v5568_v19  ;;  %3497 = vmatprep.subr.bf16.mxu1 %v3746_v0 }
 0x1da   :  { %3407 = vmatprep.mubr.msk.bf16.mxu0 %vm113_vm0, %v5569_v38 }
 0x1dc   :  { %3498 = vmatpush3.bf16.msra.mxu1 %v3746_v0 }
 0x1dd   :  { %3515 = vmatprep.subr.bf16.mxu1 %v3747_v9 }
 0x1df   :  { %3484 = vmatmul.mubr.msk.bf16.gmra.mrb[0].mxu1 %vm113_vm0, %v4548_v45 }
 0x1e0   :  { %3487 = vmatprep.mubr.msk.bf16.mxu1 %vm113_vm0, %v4586_v36 }
 0x1e1   :  { %3408 = vmatmul.mubr.msk.bf16.gmra.mrb[20].mxu0 %vm113_vm0, %v1103_v16 }
 0x1e7   :  { %3488 = vmatmul.mubr.msk.bf16.gmra.mrb[4].mxu1 %vm113_vm0, %v5570_v3 }
 0x1e8   :  { %3499 = vmatprep.mubr.msk.bf16.mxu1 %vm113_vm0, %v4335_v31  ;;  %v1794_v31 = vpack.c.bf16 %v5571_v61, %v4591_v1 }
 0x1ef   :  { %3500 = vmatmul.mubr.msk.bf16.vlgmr.msra.gmra.mrb[8].mxu1 %vm113_vm0, %v4362_v37  ;;  %v5572_v37 = vld [vmem:[#allocation6_spill] sm:$0xff] }
 0x1f0   :  { %3516 = vmatpush3.bf16.msra.mxu1 %v3747_v9  ;;  %3503 = vmatprep.mubr.msk.bf16.mxu1 %vm113_vm0, %v4455_v48  ;;  %v1795_v48 = vpack.c.bf16 %v5571_v61, %v4486_v52 }
 0x1f1   :  { %3517 = vmatprep.subr.bf16.mxu1 %v3748_v54 }
 0x1f4   :  { %3518 = vmatpush3.bf16.msra.mxu1 %v3748_v54 }
 0x1f5   :  { %3519 = vmatprep.subr.bf16.mxu1 %v3749_v47 }
 0x1f7   :  { %3504 = vmatmul.mubr.msk.bf16.gmra.mrb[12].mxu1 %vm113_vm0, %v1794_v31 }
 0x1f8   :  { %3507 = vmatprep.mubr.msk.bf16.mxu1 %vm113_vm0, %v4409_v32  ;;  %3520 = vmatpush3.bf16.msra.mxu1 %v3749_v47  ;;  %v5573_v32 = vpack.c.bf16 %v4610_v2, %v4679_v14 }
 0x1f9   :  { %3521 = vmatprep.subr.bf16.mxu1 %v3750_v53 }
 0x1fc   :  { %3522 = vmatpush3.bf16.msra.mxu1 %v3750_v53 }
 0x1ff   :  { %3508 = vmatmul.mubr.msk.bf16.gmra.mrb[0].mxu1 %vm113_vm0, %v4431_v50 }
 0x200   :  { %3511 = vmatprep.mubr.msk.bf16.mxu1 %vm113_vm0, %v5572_v37 }
 0x207   :  { %3512 = vmatmul.mubr.msk.bf16.gmra.mrb[4].mxu1 %vm113_vm0, %v1795_v48 }
 0x208   :  { %3523 = vmatprep.mubr.msk.bf16.mxu1 %vm113_vm0, %v4572_v11 }
 0x20f   :  { %3524 = vmatmul.mubr.msk.bf16.vlgmr.msra.gmra.mrb[8].mxu1 %vm113_vm0, %v4602_v41 }
 0x210   :  { %3527 = vmatprep.mubr.msk.bf16.mxu1 %vm113_vm0, %v917_v13 }
 0x217   :  { %3528 = vmatmul.mubr.msk.bf16.gmra.mrb[12].mxu1 %vm113_vm0, %v1948_v15 }
 0x218   :  { %3531 = vmatprep.mubr.msk.bf16.mxu1 %vm113_vm0, %v4672_v24 }
 0x21f   :  { %3532 = vmatmul.mubr.msk.bf16.gmra.mrb[0].mxu1 %vm113_vm0, %v4676_v12 }
 0x220   :  { %3535 = vmatprep.mubr.msk.bf16.mxu1 %vm113_vm0, %v4683_v7  ;;  %v3751_v7 = vld [vmem:[%s5545_s3] sm:$0xff]  }
 0x221   :  { %3539 = vmatprep.subr.bf16.mxu0 %v3751_v7 }
 0x222   :  { %3540 = vmatpush3.bf16.msra.mxu0 %v3751_v7 }
 0x223   :  { %3541 = vmatprep.subr.bf16.mxu0 %v3752_v58 }
 0x226   :  { %3542 = vmatpush3.bf16.msra.mxu0 %v3752_v58 }
 0x227   :  { %3536 = vmatmul.mubr.msk.bf16.gmra.mrb[4].mxu1 %vm113_vm0, %v5573_v32  ;;  %3543 = vmatprep.subr.bf16.mxu0 %v3753_v49 }
 0x22a   :  { %3544 = vmatpush3.bf16.msra.mxu0 %v3753_v49 }
 0x22b   :  { %3545 = vmatprep.subr.bf16.mxu0 %v3754_v46 }
 0x22e   :  { %3546 = vmatpush3.bf16.msra.mxu0 %v3754_v46 }
 0x29c   :  { %v3389_v50 = vpop.f32.mrb[24].mxu0 }
 0x29d   :  { %v1045_v52 = vpop.f32.mrb[25].mxu0 }
 0x29e   :  { %v3390_v59 = vpop.f32.mrb[26].mxu0 }
 0x29f   :  { %v4929_v29 = vpop.f32.mrb[27].mxu0 }
 0x2a4   :  { %v4931_v45 = vpop.f32.mrb[28].mxu0 }
 0x2a5   :  { %v4933_v11 = vpop.f32.mrb[29].mxu0 }
 0x2a6   :  { %v4935_v36 = vpop.f32.mrb[30].mxu0 }
 0x2a7   :  { %v4937_v1 = vpop.f32.mrb[31].mxu0 }
 0x2ac   :  { %v3405_v41 = vpop.f32.mrb[16].mxu0 }
 0x2ad   :  { %v1199_v40 = vpop.f32.mrb[17].mxu0 }
 0x2ae   :  { %v3406_v28 = vpop.f32.mrb[18].mxu0 }
 0x2af   :  { %v1202_v4 = vpop.f32.mrb[19].mxu0 }
 0x2b4   :  { %v3409_v2 = vpop.f32.mrb[20].mxu0 }
 0x2b5   :  { %v1215_v16 = vpop.f32.mrb[21].mxu0 }
 0x2b6   :  { %v3410_v21 = vpop.f32.mrb[22].mxu0 }
 0x2b7   :  { %v1218_v55 = vpop.f32.mrb[23].mxu0 }
 0x2e2   :  { %v3525_v24 = vpop.f32.mrb[8].mxu1 }
 0x2e3   :  { %v4939_v12 = vadd.f32 %v3525_v24, %v3405_v41  ;;  %v2023_v14 = vpop.f32.mrb[9].mxu1 }
 0x2e4   :  { %v4947_v15 = vadd.f32 %v2023_v14, %v1199_v40  ;;  %v3526_v23 = vpop.f32.mrb[10].mxu1 }
 0x2e5   :  { %v4949_v43 = vadd.f32 %v3526_v23, %v3406_v28  ;;  %v2026_v33 = vpop.f32.mrb[11].mxu1  ;;  %v2107_v20 = vsel %vm113_vm0, %v4939_v12, 0.0 }
 0x2e6   :  { %v4951_v44 = vadd.f32 %v2026_v33, %v1202_v4  ;;  %v2104_v26 = vsel %vm113_vm0, %v4947_v15, 0.0 }
 0x2e7   :  { %v2109_v6 = vsel %vm113_vm0, %v4949_v43, 0.0 }
 0x2e8   :  { %v2105_v10 = vsel %vm113_vm0, %v4951_v44, 0.0 }
 0x2e9   :  { %v2106_v57 = vadd.f32 %v2105_v10, %v2104_v26 }
 0x2ea   :  { %v3529_v25 = vpop.f32.mrb[12].mxu1 }
 0x2eb   :  { %v2108_v42 = vadd.f32 %v2107_v20, %v2106_v57  ;;  %v4962_v51 = vadd.f32 %v3529_v25, %v3409_v2  ;;  %v2039_v8 = vpop.f32.mrb[13].mxu1 }
 0x2ec   :  { %v3576_v18 = vadd.f32 %v2039_v8, %v1215_v16  ;;  %v3530_v22 = vpop.f32.mrb[14].mxu1 }
 0x2ed   :  { %v2110_v34 = vadd.f32 %v2109_v6, %v2108_v42  ;;  %v3577_v30 = vadd.f32 %v3530_v22, %v3410_v21  ;;  %v2042_v56 = vpop.f32.mrb[15].mxu1  ;;  %v2115_v62 = vsel %vm113_vm0, %v4962_v51, 0.0 }
 0x2ee   :  { %v2111_v13 = vsel %vm113_vm0, %v3576_v18, 0.0  ;;  %v3578_v39 = vadd.f32 %v2042_v56, %v1218_v55 }
 0x2ef   :  { %v2112_v27 = vadd.f32 %v2111_v13, %v2110_v34  ;;  %v2117_v19 = vsel %vm113_vm0, %v3577_v30, 0.0 }
 0x2f0   :  { %v2113_v17 = vsel %vm113_vm0, %v3578_v39, 0.0 }
 0x2f1   :  { %v2114_v35 = vadd.f32 %v2113_v17, %v2112_v27 }
 0x2f2   :  { %v3533_v5 = vpop.f32.mrb[0].mxu1 }
 0x2f3   :  { %v2116_v60 = vadd.f32 %v2115_v62, %v2114_v35  ;;  %v3579_v63 = vadd.f32 %v3533_v5, %v3389_v50  ;;  %v2055_v0 = vpop.f32.mrb[1].mxu1 }
 0x2f4   :  { %v3580_v9 = vadd.f32 %v2055_v0, %v1045_v52  ;;  %v3534_v38 = vpop.f32.mrb[2].mxu1 }
 0x2f5   :  { %v2118_v3 = vadd.f32 %v2117_v19, %v2116_v60  ;;  %v3581_v54 = vadd.f32 %v3534_v38, %v3390_v59  ;;  %v2058_v47 = vpop.f32.mrb[3].mxu1  ;;  %v2123_v32 = vsel %vm113_vm0, %v3579_v63, 0.0 }
 0x2f6   :  { %v2119_v61 = vsel %vm113_vm0, %v3580_v9, 0.0  ;;  %v3582_v31 = vadd.f32 %v2058_v47, %v4929_v29 }
 0x2f7   :  { %v2120_v53 = vadd.f32 %v2119_v61, %v2118_v3  ;;  %v2125_v52 = vsel %vm113_vm0, %v3581_v54, 0.0 }
 0x2f8   :  { %v2121_v37 = vsel %vm113_vm0, %v3582_v31, 0.0 }
 0x2f9   :  { %v2122_v48 = vadd.f32 %v2121_v37, %v2120_v53 }
 0x2fa   :  { %v3537_v41 = vpop.f32.mrb[4].mxu1 }
 0x2fb   :  { %v2124_v50 = vadd.f32 %v2123_v32, %v2122_v48  ;;  %v3583_v40 = vadd.f32 %v3537_v41, %v4931_v45  ;;  %v2071_v28 = vpop.f32.mrb[5].mxu1 }
 0x2fc   :  { %v3584_v59 = vadd.f32 %v2071_v28, %v4933_v11  ;;  %v3538_v4 = vpop.f32.mrb[6].mxu1 }
 0x2fd   :  { %v2126_v2 = vadd.f32 %v2125_v52, %v2124_v50  ;;  %v3585_v16 = vadd.f32 %v3538_v4, %v4935_v36  ;;  %v2074_v29 = vpop.f32.mrb[7].mxu1  ;;  %v2131_v45 = vsel %vm113_vm0, %v3583_v40, 0.0 }
 0x2fe   :  { %v2127_v21 = vsel %vm113_vm0, %v3584_v59, 0.0  ;;  %v3586_v55 = vadd.f32 %v2074_v29, %v4937_v1 }
 0x2ff   :  { %v2128_v24 = vadd.f32 %v2127_v21, %v2126_v2  ;;  %v2133_v23 = vsel %vm113_vm0, %v3585_v16, 0.0 }
 0x300   :  { %v2129_v14 = vsel %vm113_vm0, %v3586_v55, 0.0 }
 0x301   :  { %v2130_v7 = vadd.f32 %v2129_v14, %v2128_v24 }
 0x303   :  { %v2132_v58 = vadd.f32 %v2131_v45, %v2130_v7 }
 0x305   :  { %v2134_v33 = vadd.f32 %v2133_v23, %v2132_v58 }
 0x307   :  { %v2135_v11 = vrot.slane %v2134_v33, 4 }
 0x309   :  { %v2136_v49 = vadd.f32 %v2135_v11, %v2134_v33 }
 0x30b   :  { %v2137_v26 = vrot.slane %v2136_v49, 2 }
 0x30d   :  { %v2138_v10 = vadd.f32 %v2137_v26, %v2136_v49 }
 0x30f   :  { %v2139_v36 = vrot.slane %v2138_v10, 1 }
 0x311   :  { %v2140_v57 = vadd.f32 %v2139_v36, %v2138_v10 }
 0x313   :  { %v2141_v20 = vmul.f32 0.0078125, %v2140_v57 }
 0x315   :  { %v4988_v25 = vsub.f32 %v4947_v15, %v2141_v20  ;;  %v4991_v1 = vsub.f32 %v4951_v44, %v2141_v20  ;;  %v4994_v42 = vsub.f32 %v4939_v12, %v2141_v20  ;;  %v4997_v8 = vsub.f32 %v4949_v43, %v2141_v20 }
 0x316   :  { %v4999_v46 = vsub.f32 %v3576_v18, %v2141_v20  ;;  %v5001_v6 = vsub.f32 %v3578_v39, %v2141_v20  ;;  %v5004_v22 = vsub.f32 %v4962_v51, %v2141_v20  ;;  %v5006_v34 = vsub.f32 %v3577_v30, %v2141_v20 }
 0x317   :  { %v5008_v15 = vsub.f32 %v3580_v9, %v2141_v20  ;;  %v5010_v56 = vsub.f32 %v3582_v31, %v2141_v20  ;;  %v5012_v44 = vsub.f32 %v3579_v63, %v2141_v20  ;;  %v5014_v12 = vsub.f32 %v3581_v54, %v2141_v20 }
 0x318   :  { %v5016_v13 = vsub.f32 %v3584_v59, %v2141_v20  ;;  %v5018_v43 = vsub.f32 %v3586_v55, %v2141_v20  ;;  %v5020_v18 = vsub.f32 %v3583_v40, %v2141_v20  ;;  %v5022_v39 = vsub.f32 %v3585_v16, %v2141_v20 }
 0x319   :  { %v2158_v51 = vmul.f32 %v4988_v25, %v4988_v25  ;;  %v2159_v30 = vmul.f32 %v4991_v1, %v4991_v1  ;;  %v2160_v27 = vmul.f32 %v4994_v42, %v4994_v42  ;;  %v2161_v17 = vmul.f32 %v4997_v8, %v4997_v8 }
 0x31a   :  { %v2162_v60 = vmul.f32 %v4999_v46, %v4999_v46  ;;  %v2163_v19 = vmul.f32 %v5001_v6, %v5001_v6  ;;  %v2164_v3 = vmul.f32 %v5004_v22, %v5004_v22  ;;  %v2165_v61 = vmul.f32 %v5006_v34, %v5006_v34 }
 0x31b   :  { %v2174_v35 = vsel %vm113_vm0, %v2158_v51, 0.0  ;;  %v2175_v62 = vsel %vm113_vm0, %v2159_v30, 0.0  ;;  %v2177_v63 = vsel %vm113_vm0, %v2160_v27, 0.0  ;;  %v2179_v9 = vsel %vm113_vm0, %v2161_v17, 0.0 }
 0x31c   :  { %v2176_v5 = vadd.f32 %v2175_v62, %v2174_v35  ;;  %v2181_v54 = vsel %vm113_vm0, %v2162_v60, 0.0  ;;  %v2183_v31 = vsel %vm113_vm0, %v2163_v19, 0.0  ;;  %v2166_v37 = vmul.f32 %v5008_v15, %v5008_v15  ;;  %v2102_v60 = vld [vmem:[%s5546_s4 + $0x2] sm:$0x1] }
 0x31d   :  { %v2185_v48 = vsel %vm113_vm0, %v2164_v3, 0.0  ;;  %v2167_v41 = vmul.f32 %v5010_v56, %v5010_v56  ;;  %v2187_v50 = vsel %vm113_vm0, %v2165_v61, 0.0  ;;  %v2168_v28 = vmul.f32 %v5012_v44, %v5012_v44  ;;  %v5574_v19 = vld [vmem:[#allocation5_spill] sm:$0xff] }
 0x31e   :  { %v2178_v0 = vadd.f32 %v2177_v63, %v2176_v5  ;;  %v2189_v52 = vsel %vm113_vm0, %v2166_v37, 0.0  ;;  %v2169_v4 = vmul.f32 %v5014_v12, %v5014_v12  ;;  %v2170_v29 = vmul.f32 %v5016_v13, %v5016_v13 }
 0x31f   :  { %v2191_v2 = vsel %vm113_vm0, %v2167_v41, 0.0  ;;  %v2193_v21 = vsel %vm113_vm0, %v2168_v28, 0.0  ;;  %v2171_v24 = vmul.f32 %v5018_v43, %v5018_v43  ;;  %v2172_v45 = vmul.f32 %v5020_v18, %v5020_v18 }
 0x320   :  { %v2180_v38 = vadd.f32 %v2179_v9, %v2178_v0  ;;  %v2195_v14 = vsel %vm113_vm0, %v2169_v4, 0.0  ;;  %v2197_v58 = vsel %vm113_vm0, %v2170_v29, 0.0  ;;  %v2173_v33 = vmul.f32 %v5022_v39, %v5022_v39 }
 0x321   :  { %v2199_v11 = vsel %vm113_vm0, %v2171_v24, 0.0  ;;  %v2201_v26 = vsel %vm113_vm0, %v2172_v45, 0.0 }
 0x322   :  { %v2182_v47 = vadd.f32 %v2181_v54, %v2180_v38  ;;  %v2203_v36 = vsel %vm113_vm0, %v2173_v33, 0.0  ;;  %v5081_v38 = vld [vmem:[%s5546_s4 + $0x3] ss:$0 sm:$0xff] }
 0x324   :  { %v2184_v53 = vadd.f32 %v2183_v31, %v2182_v47 }
 0x326   :  { %v2186_v32 = vadd.f32 %v2185_v48, %v2184_v53 }
 0x328   :  { %v2188_v40 = vadd.f32 %v2187_v50, %v2186_v32 }
 0x32a   :  { %v2190_v59 = vadd.f32 %v2189_v52, %v2188_v40 }
 0x32c   :  { %v2192_v16 = vadd.f32 %v2191_v2, %v2190_v59 }
 0x32e   :  { %v2194_v55 = vadd.f32 %v2193_v21, %v2192_v16 }
 0x330   :  { %v2196_v7 = vadd.f32 %v2195_v14, %v2194_v55 }
 0x332   :  { %v2198_v23 = vadd.f32 %v2197_v58, %v2196_v7 }
 0x334   :  { %v2200_v49 = vadd.f32 %v2199_v11, %v2198_v23 }
 0x336   :  { %v2202_v10 = vadd.f32 %v2201_v26, %v2200_v49 }
 0x338   :  { %v2204_v57 = vadd.f32 %v2203_v36, %v2202_v10 }
 0x33a   :  { %v2205_v20 = vrot.slane %v2204_v57, 4 }
 0x33c   :  { %v2206_v51 = vadd.f32 %v2205_v20, %v2204_v57 }
 0x33e   :  { %v2207_v30 = vrot.slane %v2206_v51, 2 }
 0x340   :  { %v2208_v27 = vadd.f32 %v2207_v30, %v2206_v51 }
 0x342   :  { %v2209_v17 = vrot.slane %v2208_v27, 1 }
 0x344   :  { %v2210_v35 = vadd.f32 %v2209_v17, %v2208_v27 }
 0x346   :  { %v2211_v62 = vmul.f32 0.0078125, %v2210_v35 }
 0x348   :  { %v2212_v5 = vadd.f32 1e-05, %v2211_v62 }
 0x34a   :  { %3797 = vrsqrt.f32 %v2212_v5 }
 0x354   :  { %v3798_v63 = vpop.eup %3797 }
 0x355   :  { %v2214_v0 = vmul.f32 %v3798_v63, %v2102_v60 }
 0x357   :  { %v5076_v9 = vrot.slane %v2214_v0, %v5574_v19 }
 0x359   :  { %v2232_v3 = vmul.f32 %v5076_v9, %v5018_v43  ;;  %v2219_v54 = vmul.f32 %v5076_v9, %v4988_v25  ;;  %v2220_v47 = vmul.f32 %v5076_v9, %v4991_v1  ;;  %v2221_v61 = vmul.f32 %v5076_v9, %v4994_v42 }
 0x35a   :  { %v2222_v31 = vmul.f32 %v5076_v9, %v4997_v8  ;;  %v2223_v53 = vmul.f32 %v5076_v9, %v4999_v46  ;;  %v2224_v37 = vmul.f32 %v5076_v9, %v5001_v6  ;;  %v2225_v43 = vmul.f32 %v5076_v9, %v5004_v22 }
 0x35b   :  { %v5100_v25 = vadd.f32 %v5081_v38, %v2219_v54  ;;  %v5103_v1 = vadd.f32 %v5081_v38, %v2220_v47  ;;  %v5106_v42 = vadd.f32 %v5081_v38, %v2221_v61  ;;  %v5109_v8 = vadd.f32 %v5081_v38, %v2232_v3 }
 0x35c   :  { %v5112_v46 = vadd.f32 %v5081_v38, %v2222_v31  ;;  %v5115_v6 = vadd.f32 %v5081_v38, %v2223_v53  ;;  %v2226_v22 = vmul.f32 %v5076_v9, %v5006_v34  ;;  %v5121_v32 = vadd.f32 %v5081_v38, %v2224_v37 }
 0x35d   :  { %v2271_v48 = vmin.f32 %v5100_v25, 0.0  ;;  %v2272_v41 = vmin.f32 %v5103_v1, 0.0  ;;  %v2273_v50 = vmin.f32 %v5106_v42, 0.0  ;;  %v2284_v52 = vmin.f32 %v5109_v8, 0.0 }
 0x35e   :  { %v2274_v28 = vmin.f32 %v5112_v46, 0.0  ;;  %v2275_v2 = vmin.f32 %v5115_v6, 0.0  ;;  %v2276_v34 = vmin.f32 %v5121_v32, 0.0  ;;  %v5130_v29 = vadd.f32 %v5081_v38, %v2225_v43 }
 0x35f   :  { %v2287_v40 = vmul.f32 1.442695, %v2271_v48  ;;  %v2289_v59 = vmul.f32 1.442695, %v2272_v41  ;;  %v2291_v4 = vmul.f32 1.442695, %v2273_v50  ;;  %v5133_v55 = vadd.f32 %v5081_v38, %v2226_v22 }
 0x360   :  { %v2293_v16 = vmul.f32 1.442695, %v2274_v28  ;;  %v2295_v21 = vmul.f32 1.442695, %v2275_v2  ;;  %v2227_v24 = vmul.f32 %v5076_v9, %v5008_v15  ;;  %v2297_v14 = vmul.f32 1.442695, %v2276_v34 }
 0x361   :  { %3799 = vpow2.f32 %v2287_v40  ;;  %v2277_v7 = vmin.f32 %v5130_v29, 0.0  ;;  %v2313_v45 = vmul.f32 1.442695, %v2284_v52  ;;  %v2278_v58 = vmin.f32 %v5133_v55, 0.0 }
 0x362   :  { %3801 = vpow2.f32 %v2289_v59  ;;  %v2228_v23 = vmul.f32 %v5076_v9, %v5010_v56  ;;  %v5142_v11 = vadd.f32 %v5081_v38, %v2227_v24  ;;  %v2229_v49 = vmul.f32 %v5076_v9, %v5012_v44 }
 0x363   :  { %3803 = vpow2.f32 %v2291_v4  ;;  %v2299_v33 = vmul.f32 1.442695, %v2277_v7  ;;  %v2301_v15 = vmul.f32 1.442695, %v2278_v58  ;;  %v2230_v10 = vmul.f32 %v5076_v9, %v5014_v12 }
 0x364   :  { %3805 = vpow2.f32 %v2293_v16  ;;  %v5147_v26 = vadd.f32 %v5081_v38, %v2228_v23  ;;  %v2279_v36 = vmin.f32 %v5142_v11, 0.0  ;;  %v5153_v56 = vadd.f32 %v5081_v38, %v2229_v49 }
 0x365   :  { %3807 = vpow2.f32 %v2295_v21  ;;  %v5157_v20 = vadd.f32 %v5081_v38, %v2230_v10  ;;  %v2231_v27 = vmul.f32 %v5076_v9, %v5016_v13  ;;  %vm2255_vm4 = vcmp.gt.f32.partialorder %v5100_v25, 0.0 }
 0x366   :  { %3809 = vpow2.f32 %v2297_v14  ;;  %v2280_v57 = vmin.f32 %v5147_v26, 0.0  ;;  %v2303_v44 = vmul.f32 1.442695, %v2279_v36  ;;  %v2281_v51 = vmin.f32 %v5153_v56, 0.0 }
 0x367   :  { %3811 = vpow2.f32 %v2299_v33  ;;  %v2282_v12 = vmin.f32 %v5157_v20, 0.0  ;;  %v2233_v35 = vmul.f32 %v5076_v9, %v5020_v18  ;;  %vm2256_vm5 = vcmp.gt.f32.partialorder %v5103_v1, 0.0 }
 0x368   :  { %3813 = vpow2.f32 %v2301_v15  ;;  %v2305_v30 = vmul.f32 1.442695, %v2280_v57  ;;  %v2307_v17 = vmul.f32 1.442695, %v2281_v51  ;;  %v5168_v60 = vadd.f32 %v5081_v38, %v2231_v27 }
 0x369   :  { %3815 = vpow2.f32 %v2313_v45  ;;  %v2309_v5 = vmul.f32 1.442695, %v2282_v12  ;;  %vm2257_vm6 = vcmp.gt.f32.partialorder %v5106_v42, 0.0  ;;  %v2234_v13 = vmul.f32 %v5076_v9, %v5022_v39 }
 0x36a   :  { %3817 = vpow2.f32 %v2303_v44  ;;  %v2283_v18 = vmin.f32 %v5168_v60, 0.0  ;;  %v5175_v47 = vadd.f32 %v5081_v38, %v2233_v35  ;;  %vm2258_vm7 = vcmp.gt.f32.partialorder %v5112_v46, 0.0 }
 0x36b   :  { %v3800_v62 = vpop.eup %3799  ;;  %3819 = vpow2.f32 %v2305_v30  ;;  %v5182_v37 = vadd.f32 %v5081_v38, %v2234_v13  ;;  %vm2259_vm8 = vcmp.gt.f32.partialorder %v5115_v6, 0.0  ;;  %vm2260_vm9 = vcmp.gt.f32.partialorder %v5121_v32, 0.0  ;;  %v2371_v13 = vld [vmem:[#allocation2] sm:$0xff] }
 0x36c   :  { %v3802_v63 = vpop.eup %3801  ;;  %v3122_v0 = vadd.f32 -1.0, %v3800_v62  ;;  %3821 = vpow2.f32 %v2307_v17  ;;  %v2311_v22 = vmul.f32 1.442695, %v2283_v18  ;;  %vm2261_vm10 = vcmp.gt.f32.partialorder %v5130_v29, 0.0 }
 0x36d   :  { %v3804_v3 = vpop.eup %3803  ;;  %v3123_v54 = vadd.f32 -1.0, %v3802_v63  ;;  %3823 = vpow2.f32 %v2309_v5  ;;  %v2286_v16 = vmin.f32 %v5182_v37, 0.0  ;;  %vm2262_vm11 = vcmp.gt.f32.partialorder %v5133_v55, 0.0 }
 0x36e   :  { %v3806_v61 = vpop.eup %3805  ;;  %v2335_v31 = vsel %vm2255_vm4, %v5100_v25, %v3122_v0  ;;  %v3124_v53 = vadd.f32 -1.0, %v3804_v3  ;;  %3825 = vpow2.f32 %v2311_v22  ;;  %vm2263_vm12 = vcmp.gt.f32.partialorder %v5142_v11, 0.0  ;;  %v2375_v22 = vld [vmem:[#allocation2 + $0x20] sm:$0xff] }
 0x36f   :  { %v3808_v39 = vpop.eup %3807  ;;  %v2336_v9 = vsel %vm2256_vm5, %v5103_v1, %v3123_v54  ;;  %v3125_v43 = vadd.f32 -1.0, %v3806_v61  ;;  %v2285_v1 = vmin.f32 %v5175_v47, 0.0  ;;  %v2317_v45 = vmul.f32 1.442695, %v2286_v16  ;;  %v2374_v54 = vld [vmem:[#allocation2 + $0x18] sm:$0xff] }
 0x370   :  { %v3810_v48 = vpop.eup %3809  ;;  %v2387_v41 = vpack.c.bf16 %v2336_v9, %v2335_v31  ;;  %v2337_v25 = vsel %vm2257_vm6, %v5106_v42, %v3124_v53  ;;  %v3126_v50 = vadd.f32 -1.0, %v3808_v39  ;;  %vm2264_vm13 = vcmp.gt.f32.partialorder %v5147_v26, 0.0  ;;  %v2372_v31 = vld [vmem:[#allocation2 + $0x8] sm:$0xff] }
 0x371   :  { %v3812_v38 = vpop.eup %3811  ;;  %v2338_v40 = vsel %vm2258_vm7, %v5112_v46, %v3125_v43  ;;  %v3127_v28 = vadd.f32 -1.0, %v3810_v48  ;;  %v2315_v46 = vmul.f32 1.442695, %v2285_v1  ;;  %vm2265_vm14 = vcmp.gt.f32.partialorder %v5153_v56, 0.0  ;;  %v2377_v43 = vld [vmem:[#allocation2 + $0x30] sm:$0xff] }
 0x372   :  { %v3814_v52 = vpop.eup %3813  ;;  %3547 = vmatprep.mubr.msk.bf16.mxu0 %vm113_vm0, %v2387_v41  ;;  %v2388_v59 = vpack.c.bf16 %v2338_v40, %v2337_v25  ;;  %v2339_v4 = vsel %vm2259_vm8, %v5115_v6, %v3126_v50  ;;  %v3128_v2 = vadd.f32 -1.0, %v3812_v38  ;;  %vm2266_vm15 = vcmp.gt.f32.partialorder %v5157_v20, 0.0  ;;  %v2378_v41 = vld [vmem:[#allocation2 + $0x38] sm:$0xff]  ;;  %v2376_v38 = vld [vmem:[#allocation2 + $0x28] sm:$0xff] }
 0x373   :  { %v3816_v42 = vpop.eup %3815  ;;  %v2340_v34 = vsel %vm2260_vm9, %v5121_v32, %v3127_v28  ;;  %v3129_v21 = vadd.f32 -1.0, %v3814_v52  ;;  %3827 = vpow2.f32 %v2315_v46  ;;  %vm2268_vm1 = vcmp.gt.f32.partialorder %v5109_v8, 0.0 }
 0x374   :  { %v3818_v24 = vpop.eup %3817  ;;  %3548 = vmatmul.mubr.msk.bf16.vlgmr.msra.gmra.mrb[32].mxu0 %vm113_vm0, %v2388_v59  ;;  %v2389_v14 = vpack.c.bf16 %v2340_v34, %v2339_v4  ;;  %v2341_v7 = vsel %vm2261_vm10, %v5130_v29, %v3128_v2  ;;  %3829 = vpow2.f32 %v2317_v45  ;;  %v3135_v57 = vadd.f32 -1.0, %v3816_v42  ;;  %v2382_v45 = vld [vmem:[#allocation2 + $0x58] sm:$0xff] }
 0x375   :  { %v3820_v6 = vpop.eup %3819  ;;  %v2342_v58 = vsel %vm2262_vm11, %v5133_v55, %v3129_v21  ;;  %v3130_v23 = vadd.f32 -1.0, %v3818_v24  ;;  %vm2267_vm2 = vcmp.gt.f32.partialorder %v5168_v60, 0.0  ;;  %vm2269_vm3 = vcmp.gt.f32.partialorder %v5175_v47, 0.0  ;;  %v2381_v21 = vld [vmem:[#allocation2 + $0x50] sm:$0xff]  ;;  %v2379_v24 = vld [vmem:[#allocation2 + $0x40] sm:$0xff] }
 0x376   :  { %v3822_v33 = vpop.eup %3821  ;;  %3551 = vmatprep.mubr.msk.bf16.mxu0 %vm113_vm0, %v2389_v14  ;;  %v2390_v32 = vpack.c.bf16 %v2342_v58, %v2341_v7  ;;  %v3131_v49 = vadd.f32 -1.0, %v3820_v6  ;;  %vm2270_vm4 = vcmp.gt.f32.partialorder %v5182_v37, 0.0 }
 0x377   :  { %v3824_v15 = vpop.eup %3823  ;;  %v2343_v10 = vsel %vm2263_vm12, %v5142_v11, %v3130_v23  ;;  %v3132_v29 = vadd.f32 -1.0, %v3822_v33  ;;  %v2380_v33 = vld [vmem:[#allocation2 + $0x48] sm:$0xff] }
 0x378   :  { %v2344_v36 = vsel %vm2264_vm13, %v5147_v26, %v3131_v49  ;;  %v3133_v55 = vadd.f32 -1.0, %v3824_v15  ;;  %v3826_v12 = vpop.eup %3825  ;;  %v2348_v26 = vsel %vm2268_vm1, %v5109_v8, %v3135_v57 }
 0x379   :  { %v2391_v44 = vpack.c.bf16 %v2344_v36, %v2343_v10  ;;  %v2345_v51 = vsel %vm2265_vm14, %v5153_v56, %v3132_v29  ;;  %v3134_v11 = vadd.f32 -1.0, %v3826_v12 }
 0x37a   :  { %v2346_v30 = vsel %vm2266_vm15, %v5157_v20, %v3133_v55 }
 0x37b   :  { %v2392_v27 = vpack.c.bf16 %v2346_v30, %v2345_v51  ;;  %v2347_v17 = vsel %vm2267_vm2, %v5168_v60, %v3134_v11  ;;  %v2373_v60 = vld [vmem:[#allocation2 + $0x10] sm:$0xff] }
 0x37c   :  { %3552 = vmatmul.mubr.msk.bf16.gmra.mrb[36].mxu0 %vm113_vm0, %v2390_v32  ;;  %v2393_v62 = vpack.c.bf16 %v2348_v26, %v2347_v17  ;;  %v2385_v11 = vld [vmem:[#allocation2 + $0x70] sm:$0xff]  ;;  %v2383_v17 = vld [vmem:[#allocation2 + $0x60] sm:$0xff] }
 0x37d   :  { %3555 = vmatprep.mubr.msk.bf16.mxu0 %vm113_vm0, %v2391_v44  ;;  %v3828_v35 = vpop.eup %3827 }
 0x37e   :  { %v3830_v56 = vpop.eup %3829  ;;  %v3136_v5 = vadd.f32 -1.0, %v3828_v35 }
 0x37f   :  { %v3137_v20 = vadd.f32 -1.0, %v3830_v56 }
 0x380   :  { %v2349_v63 = vsel %vm2269_vm3, %v5175_v47, %v3136_v5  ;;  %v2386_v5 = vld [vmem:[#allocation2 + $0x78] sm:$0xff] }
 0x381   :  { %v2350_v0 = vsel %vm2270_vm4, %v5182_v37, %v3137_v20 }
 0x382   :  { %v2394_v8 = vpack.c.bf16 %v2350_v0, %v2349_v63 }
 0x384   :  { %3556 = vmatmul.mubr.msk.bf16.gmra.mrb[40].mxu0 %vm113_vm0, %v2392_v27 }
 0x385   :  { %3559 = vmatprep.mubr.msk.bf16.mxu0 %vm113_vm0, %v2393_v62 }
 0x38c   :  { %3560 = vmatmul.mubr.msk.bf16.gmra.mrb[44].mxu0 %vm113_vm0, %v2394_v8  ;;  %v2384_v8 = vld [vmem:[#allocation2 + $0x68] sm:$0xff] }
 0x447   :  { %v3549_v3 = vpop.f32.mrb[32].mxu0 }
 0x448   :  { %v2550_v18 = vadd.f32 %v3549_v3, %v2373_v60  ;;  %v2485_v61 = vpop.f32.mrb[33].mxu0 }
 0x449   :  { %v2548_v53 = vadd.f32 %v2485_v61, %v2371_v13  ;;  %v3550_v39 = vpop.f32.mrb[34].mxu0 }
 0x44a   :  { %2566 = vst.msk [vmem:[#allocation2 + $0x10] sm:$0xff] %vm113_vm0, %v2550_v18  ;;  %v2551_v47 = vadd.f32 %v3550_v39, %v2374_v54  ;;  %v2488_v37 = vpop.f32.mrb[35].mxu0 }
 0x44b   :  { %2564 = vst.msk [vmem:[#allocation2] sm:$0xff] %vm113_vm0, %v2548_v53  ;;  %v2549_v9 = vadd.f32 %v2488_v37, %v2372_v31 }
 0x44c   :  { %2567 = vst.msk [vmem:[#allocation2 + $0x18] sm:$0xff] %vm113_vm0, %v2551_v47 }
 0x44d   :  { %2565 = vst.msk [vmem:[#allocation2 + $0x8] sm:$0xff] %vm113_vm0, %v2549_v9 }
 0x44f   :  { %v3553_v48 = vpop.f32.mrb[36].mxu0 }
 0x450   :  { %v2554_v25 = vadd.f32 %v3553_v48, %v2377_v43  ;;  %v2501_v50 = vpop.f32.mrb[37].mxu0 }
 0x451   :  { %v2552_v40 = vadd.f32 %v2501_v50, %v2375_v22  ;;  %v3554_v28 = vpop.f32.mrb[38].mxu0  ;;  %v5233_v2 = vld [vmem:[#allocation2 + $0x10] sm:$0xff] }
 0x452   :  { %v5229_v1 = vld [vmem:[#allocation2] sm:$0xff]  ;;  %2570 = vst.msk [vmem:[#allocation2 + $0x30] sm:$0xff] %vm113_vm0, %v2554_v25  ;;  %v2555_v52 = vadd.f32 %v3554_v28, %v2378_v41  ;;  %v2504_v59 = vpop.f32.mrb[39].mxu0  ;;  %v2604_v6 = vsel %vm113_vm0, %v5233_v2, 0.0 }
 0x453   :  { %2568 = vst.msk [vmem:[#allocation2 + $0x20] sm:$0xff] %vm113_vm0, %v2552_v40  ;;  %v2553_v4 = vadd.f32 %v2504_v59, %v2376_v38  ;;  %v2601_v42 = vsel %vm113_vm0, %v5229_v1, 0.0  ;;  %v5243_v46 = vld [vmem:[#allocation2 + $0x18] sm:$0xff] }
 0x454   :  { %v5235_v16 = vld [vmem:[#allocation2 + $0x8] sm:$0xff]  ;;  %2571 = vst.msk [vmem:[#allocation2 + $0x38] sm:$0xff] %vm113_vm0, %v2555_v52  ;;  %v2606_v10 = vsel %vm113_vm0, %v5243_v46, 0.0 }
 0x455   :  { %v2602_v34 = vsel %vm113_vm0, %v5235_v16, 0.0  ;;  %2569 = vst.msk [vmem:[#allocation2 + $0x28] sm:$0xff] %vm113_vm0, %v2553_v4 }
 0x456   :  { %v2603_v14 = vadd.f32 %v2602_v34, %v2601_v42 }
 0x457   :  { %v3557_v7 = vpop.f32.mrb[40].mxu0 }
 0x458   :  { %v2558_v58 = vadd.f32 %v3557_v7, %v2381_v21  ;;  %v2517_v23 = vpop.f32.mrb[41].mxu0  ;;  %v2605_v32 = vadd.f32 %v2604_v6, %v2603_v14 }
 0x459   :  { %v2556_v49 = vadd.f32 %v2517_v23, %v2379_v24  ;;  %v3558_v15 = vpop.f32.mrb[42].mxu0  ;;  %v5258_v12 = vld [vmem:[#allocation2 + $0x30] sm:$0xff] }
 0x45a   :  { %v5249_v29 = vld [vmem:[#allocation2 + $0x20] sm:$0xff]  ;;  %2574 = vst.msk [vmem:[#allocation2 + $0x50] sm:$0xff] %vm113_vm0, %v2558_v58  ;;  %v2559_v36 = vadd.f32 %v3558_v15, %v2382_v45  ;;  %v2520_v55 = vpop.f32.mrb[43].mxu0  ;;  %v2607_v57 = vadd.f32 %v2606_v10, %v2605_v32  ;;  %v2612_v20 = vsel %vm113_vm0, %v5258_v12, 0.0 }
 0x45b   :  { %2572 = vst.msk [vmem:[#allocation2 + $0x40] sm:$0xff] %vm113_vm0, %v2556_v49  ;;  %v2557_v44 = vadd.f32 %v2520_v55, %v2380_v33  ;;  %v2608_v51 = vsel %vm113_vm0, %v5249_v29, 0.0  ;;  %v5263_v35 = vld [vmem:[#allocation2 + $0x38] sm:$0xff] }
 0x45c   :  { %2575 = vst.msk [vmem:[#allocation2 + $0x58] sm:$0xff] %vm113_vm0, %v2559_v36  ;;  %v5256_v30 = vld [vmem:[#allocation2 + $0x28] sm:$0xff]  ;;  %v2609_v27 = vadd.f32 %v2608_v51, %v2607_v57  ;;  %v2614_v54 = vsel %vm113_vm0, %v5263_v35, 0.0 }
 0x45d   :  { %2573 = vst.msk [vmem:[#allocation2 + $0x48] sm:$0xff] %vm113_vm0, %v2557_v44  ;;  %v2610_v26 = vsel %vm113_vm0, %v5256_v30, 0.0 }
 0x45e   :  { %v2611_v62 = vadd.f32 %v2610_v26, %v2609_v27 }
 0x45f   :  { %v3561_v56 = vpop.f32.mrb[44].mxu0 }
 0x460   :  { %v2562_v63 = vadd.f32 %v3561_v56, %v2385_v11  ;;  %v2533_v0 = vpop.f32.mrb[45].mxu0  ;;  %v2613_v60 = vadd.f32 %v2612_v20, %v2611_v62 }
 0x461   :  { %v2560_v13 = vadd.f32 %v2533_v0, %v2383_v17  ;;  %v3562_v3 = vpop.f32.mrb[46].mxu0  ;;  %v2593_v9 = vld [vmem:[#allocation2 + $0x50] sm:$0xff] }
 0x462   :  { %2578 = vst.msk [vmem:[#allocation2 + $0x70] sm:$0xff] %vm113_vm0, %v2562_v63  ;;  %v2563_v18 = vadd.f32 %v3562_v3, %v2386_v5  ;;  %v2536_v61 = vpop.f32.mrb[47].mxu0  ;;  %v2591_v31 = vld [vmem:[#allocation2 + $0x40] sm:$0xff]  ;;  %v2615_v53 = vadd.f32 %v2614_v54, %v2613_v60  ;;  %v2620_v25 = vsel %vm113_vm0, %v2593_v9, 0.0 }
 0x463   :  { %2576 = vst.msk [vmem:[#allocation2 + $0x60] sm:$0xff] %vm113_vm0, %v2560_v13  ;;  %v2561_v39 = vadd.f32 %v2536_v61, %v2384_v8  ;;  %v2616_v47 = vsel %vm113_vm0, %v2591_v31, 0.0  ;;  %v2594_v48 = vld [vmem:[#allocation2 + $0x58] sm:$0xff] }
 0x464   :  { %2579 = vst.msk [vmem:[#allocation2 + $0x78] sm:$0xff] %vm113_vm0, %v2563_v18  ;;  %v2592_v37 = vld [vmem:[#allocation2 + $0x48] sm:$0xff]  ;;  %v2617_v43 = vadd.f32 %v2616_v47, %v2615_v53  ;;  %v2622_v38 = vsel %vm113_vm0, %v2594_v48, 0.0 }
 0x465   :  { %2577 = vst.msk [vmem:[#allocation2 + $0x68] sm:$0xff] %vm113_vm0, %v2561_v39  ;;  %v2618_v22 = vsel %vm113_vm0, %v2592_v37, 0.0 }
 0x466   :  { %v2619_v41 = vadd.f32 %v2618_v22, %v2617_v43 }
 0x468   :  { %v2621_v50 = vadd.f32 %v2620_v25, %v2619_v41 }
 0x469   :  { %v2597_v4 = vld [vmem:[#allocation2 + $0x70] sm:$0xff] }
 0x46a   :  { %v2595_v40 = vld [vmem:[#allocation2 + $0x60] sm:$0xff]  ;;  %v2623_v28 = vadd.f32 %v2622_v38, %v2621_v50  ;;  %v2628_v14 = vsel %vm113_vm0, %v2597_v4, 0.0 }
 0x46b   :  { %v2624_v52 = vsel %vm113_vm0, %v2595_v40, 0.0  ;;  %v2598_v21 = vld [vmem:[#allocation2 + $0x78] sm:$0xff] }
 0x46c   :  { %v2596_v59 = vld [vmem:[#allocation2 + $0x68] sm:$0xff]  ;;  %v2625_v42 = vadd.f32 %v2624_v52, %v2623_v28  ;;  %v2630_v45 = vsel %vm113_vm0, %v2598_v21, 0.0 }
 0x46d   :  { %v2626_v34 = vsel %vm113_vm0, %v2596_v59, 0.0 }
 0x46e   :  { %v2627_v24 = vadd.f32 %v2626_v34, %v2625_v42 }
 0x470   :  { %v2629_v7 = vadd.f32 %v2628_v14, %v2627_v24 }
 0x472   :  { %v2631_v6 = vadd.f32 %v2630_v45, %v2629_v7 }
 0x474   :  { %v2632_v58 = vrot.slane %v2631_v6, 4 }
 0x476   :  { %v2633_v23 = vadd.f32 %v2632_v58, %v2631_v6 }
 0x478   :  { %v2634_v33 = vrot.slane %v2633_v23, 2 }
 0x47a   :  { %v2635_v32 = vadd.f32 %v2634_v33, %v2633_v23 }
 0x47c   :  { %v2636_v49 = vrot.slane %v2635_v32, 1 }
 0x47e   :  { %v2637_v15 = vadd.f32 %v2636_v49, %v2635_v32 }
 0x480   :  { %v2638_v10 = vmul.f32 0.0078125, %v2637_v15 }
 0x482   :  { %v5282_v36 = vsub.f32 %v5229_v1, %v2638_v10  ;;  %v5285_v55 = vsub.f32 %v5235_v16, %v2638_v10  ;;  %v5288_v57 = vsub.f32 %v5233_v2, %v2638_v10  ;;  %v5291_v44 = vsub.f32 %v5243_v46, %v2638_v10 }
 0x483   :  { %v5298_v11 = vsub.f32 %v5249_v29, %v2638_v10  ;;  %v5303_v16 = vsub.f32 %v5256_v30, %v2638_v10  ;;  %v5310_v62 = vsub.f32 %v5258_v12, %v2638_v10  ;;  %v5316_v30 = vsub.f32 %v5263_v35, %v2638_v10 }
 0x484   :  { %v2655_v51 = vmul.f32 %v5282_v36, %v5282_v36  ;;  %v2656_v27 = vmul.f32 %v5285_v55, %v5285_v55  ;;  %v2657_v1 = vmul.f32 %v5288_v57, %v5288_v57  ;;  %v2658_v2 = vmul.f32 %v5291_v44, %v5291_v44 }
 0x485   :  { %v2659_v29 = vmul.f32 %v5298_v11, %v5298_v11  ;;  %v2660_v20 = vmul.f32 %v5303_v16, %v5303_v16  ;;  %v5321_v8 = vsub.f32 %v2591_v31, %v2638_v10  ;;  %v2661_v12 = vmul.f32 %v5310_v62, %v5310_v62 }
 0x486   :  { %v2671_v46 = vsel %vm113_vm0, %v2655_v51, 0.0  ;;  %v2672_v26 = vsel %vm113_vm0, %v2656_v27, 0.0  ;;  %v2674_v56 = vsel %vm113_vm0, %v2657_v1, 0.0  ;;  %v2676_v63 = vsel %vm113_vm0, %v2658_v2, 0.0 }
 0x487   :  { %v2673_v17 = vadd.f32 %v2672_v26, %v2671_v46  ;;  %v2678_v60 = vsel %vm113_vm0, %v2659_v29, 0.0  ;;  %v5326_v3 = vsub.f32 %v2592_v37, %v2638_v10  ;;  %v2662_v35 = vmul.f32 %v5316_v30, %v5316_v30 }
 0x488   :  { %v2680_v54 = vsel %vm113_vm0, %v2660_v20, 0.0  ;;  %v5331_v61 = vsub.f32 %v2593_v9, %v2638_v10  ;;  %v2663_v31 = vmul.f32 %v5321_v8, %v5321_v8  ;;  %v2682_v53 = vsel %vm113_vm0, %v2661_v12, 0.0 }
 0x489   :  { %v2675_v5 = vadd.f32 %v2674_v56, %v2673_v17  ;;  %v5336_v47 = vsub.f32 %v2594_v48, %v2638_v10  ;;  %v2664_v37 = vmul.f32 %v5326_v3, %v5326_v3  ;;  %v2684_v43 = vsel %vm113_vm0, %v2662_v35, 0.0  ;;  %v2599_v56 = vld [vmem:[%s5547_s5] sm:$0x1] }
 0x48a   :  { %v5341_v41 = vsub.f32 %v2595_v40, %v2638_v10  ;;  %v2665_v9 = vmul.f32 %v5331_v61, %v5331_v61  ;;  %v2686_v25 = vsel %vm113_vm0, %v2663_v31, 0.0  ;;  %v5346_v38 = vsub.f32 %v2596_v59, %v2638_v10  ;;  %v3869_v35 = vld [vmem:[%s5542_s0] sm:$0xff]  }
 0x48b   :  { %v2677_v0 = vadd.f32 %v2676_v63, %v2675_v5  ;;  %v2666_v48 = vmul.f32 %v5336_v47, %v5336_v47  ;;  %v2688_v28 = vsel %vm113_vm0, %v2664_v37, 0.0  ;;  %v5351_v42 = vsub.f32 %v2597_v4, %v2638_v10 }
 0x48c   :  { %v2667_v40 = vmul.f32 %v5341_v41, %v5341_v41  ;;  %v2690_v34 = vsel %vm113_vm0, %v2665_v9, 0.0  ;;  %v5356_v14 = vsub.f32 %v2598_v21, %v2638_v10  ;;  %v2668_v59 = vmul.f32 %v5346_v38, %v5346_v38 }
 0x48d   :  { %v2679_v13 = vadd.f32 %v2678_v60, %v2677_v0  ;;  %v2692_v7 = vsel %vm113_vm0, %v2666_v48, 0.0  ;;  %v2669_v6 = vmul.f32 %v5351_v42, %v5351_v42 }
 0x48e   :  { %v2694_v4 = vsel %vm113_vm0, %v2667_v40, 0.0  ;;  %v2670_v23 = vmul.f32 %v5356_v14, %v5356_v14  ;;  %v2696_v33 = vsel %vm113_vm0, %v2668_v59, 0.0 }
 0x48f   :  { %v2681_v18 = vadd.f32 %v2680_v54, %v2679_v13  ;;  %v2698_v21 = vsel %vm113_vm0, %v2669_v6, 0.0  ;;  %v5379_v13 = vld [vmem:[%s5547_s5 + $0x1] ss:$0 sm:$0xff]  ;;  %v2752_v54 = vunpack.c.l.bf16 %v3869_v35 }
 0x490   :  { %v2700_v15 = vsel %vm113_vm0, %v2670_v23, 0.0 }
 0x491   :  { %v2683_v39 = vadd.f32 %v2682_v53, %v2681_v18 }
 0x493   :  { %v2685_v22 = vadd.f32 %v2684_v43, %v2683_v39  ;;  %v2753_v39 = vunpack.c.h.bf16 %v3869_v35  ;;  %v3871_v43 = vld [vmem:[%s5542_s0 + $0x10] sm:$0xff]  }
 0x494   :  { %v2757_v9 = vunpack.c.h.bf16 %v3871_v43 }
 0x495   :  { %v2687_v50 = vadd.f32 %v2686_v25, %v2685_v22  ;;  %v2756_v22 = vunpack.c.l.bf16 %v3871_v43 }
 0x497   :  { %v2689_v52 = vadd.f32 %v2688_v28, %v2687_v50 }
 0x499   :  { %v2691_v24 = vadd.f32 %v2690_v34, %v2689_v52 }
 0x49b   :  { %v2693_v45 = vadd.f32 %v2692_v7, %v2691_v24  ;;  %v3874_v7 = vld [vmem:[%s5542_s0 + $0x28] sm:$0xff]  }
 0x49d   :  { %v2695_v58 = vadd.f32 %v2694_v4, %v2693_v45  ;;  %v2762_v45 = vunpack.c.l.bf16 %v3874_v7 }
 0x49f   :  { %v2697_v32 = vadd.f32 %v2696_v33, %v2695_v58  ;;  %v2763_v58 = vunpack.c.h.bf16 %v3874_v7 }
 0x4a1   :  { %v2699_v49 = vadd.f32 %v2698_v21, %v2697_v32 }
 0x4a3   :  { %v2701_v10 = vadd.f32 %v2700_v15, %v2699_v49 }
 0x4a5   :  { %v2702_v51 = vrot.slane %v2701_v10, 4 }
 0x4a7   :  { %v2703_v27 = vadd.f32 %v2702_v51, %v2701_v10 }
 0x4a9   :  { %v2704_v1 = vrot.slane %v2703_v27, 2 }
 0x4ab   :  { %v2705_v2 = vadd.f32 %v2704_v1, %v2703_v27 }
 0x4ad   :  { %v2706_v46 = vrot.slane %v2705_v2, 1 }
 0x4af   :  { %v2707_v26 = vadd.f32 %v2706_v46, %v2705_v2 }
 0x4b1   :  { %v2708_v17 = vmul.f32 0.0078125, %v2707_v26 }
 0x4b3   :  { %v2709_v29 = vadd.f32 1e-05, %v2708_v17 }
 0x4b5   :  { %3831 = vrsqrt.f32 %v2709_v29 }
 0x4bf   :  { %v3832_v5 = vpop.eup %3831 }
 0x4c0   :  { %v2711_v20 = vmul.f32 %v3832_v5, %v2599_v56 }
 0x4c2   :  { %v2715_v63 = vrot.slane %v2711_v20, %v5574_v19  ;;  %v3870_v19 = vld [vmem:[%s5542_s0 + $0x8] sm:$0xff]  }
 0x4c3   :  { %v2754_v18 = vunpack.c.l.bf16 %v3870_v19 }
 0x4c4   :  { %v2716_v0 = vmul.f32 %v2715_v63, %v5282_v36  ;;  %v2718_v12 = vmul.f32 %v2715_v63, %v5288_v57  ;;  %v2719_v60 = vmul.f32 %v2715_v63, %v5291_v44  ;;  %v2755_v36 = vunpack.c.h.bf16 %v3870_v19 }
 0x4c5   :  { %v2717_v57 = vmul.f32 %v2715_v63, %v5285_v55  ;;  %v2720_v37 = vmul.f32 %v2715_v63, %v5298_v11  ;;  %v2721_v25 = vmul.f32 %v2715_v63, %v5303_v16  ;;  %v2722_v50 = vmul.f32 %v2715_v63, %v5310_v62  ;;  %v3872_v11 = vld [vmem:[%s5542_s0 + $0x18] sm:$0xff]   ;;  %v3873_v16 = vld [vmem:[%s5542_s0 + $0x20] sm:$0xff]  }
 0x4c6   :  { %v2736_v44 = vadd.f32 %v5379_v13, %v2716_v0  ;;  %v2738_v31 = vadd.f32 %v5379_v13, %v2718_v12  ;;  %v2739_v53 = vadd.f32 %v5379_v13, %v2719_v60  ;;  %v2758_v40 = vunpack.c.l.bf16 %v3872_v11 }
 0x4c7   :  { %v2737_v55 = vadd.f32 %v5379_v13, %v2717_v57  ;;  %v2759_v34 = vunpack.c.h.bf16 %v3872_v11  ;;  %v2760_v24 = vunpack.c.l.bf16 %v3873_v16  ;;  %v2723_v62 = vmul.f32 %v2715_v63, %v5316_v30  ;;  %v3875_v30 = vld [vmem:[%s5542_s0 + $0x30] sm:$0xff]  }
 0x4c8   :  { %v5398_v48 = vadd.f32 %v2752_v54, %v2736_v44  ;;  %v5400_v28 = vadd.f32 %v2754_v18, %v2738_v31  ;;  %v5402_v52 = vadd.f32 %v2755_v36, %v2739_v53  ;;  %v2761_v59 = vunpack.c.h.bf16 %v3873_v16 }
 0x4c9   :  { %v2724_v6 = vmul.f32 %v2715_v63, %v5321_v8  ;;  %v2740_v4 = vadd.f32 %v5379_v13, %v2720_v37  ;;  %v2725_v23 = vmul.f32 %v2715_v63, %v5326_v3  ;;  %v2741_v33 = vadd.f32 %v5379_v13, %v2721_v25  ;;  %v3876_v8 = vld [vmem:[%s5542_s0 + $0x38] sm:$0xff]   ;;  %s3902_s0 = smov [#allocation2]  }
 0x4ca   :  { %v2742_v32 = vadd.f32 %v5379_v13, %v2722_v50  ;;  %v2764_v21 = vunpack.c.l.bf16 %v3875_v30  ;;  %v2765_v49 = vunpack.c.h.bf16 %v3875_v30  ;;  %v2726_v15 = vmul.f32 %v2715_v63, %v5331_v61  ;;  %s2901_s7 = sshll.u32 %s3902_s0, 4  ;;  %s2902_s7 = int_to_ptr.vmem [resolvable:$true] %s2901_s7 }
 0x4cb   :  { %v5423_v10 = vadd.f32 %v2753_v39, %v2737_v55  ;;  %v2766_v51 = vunpack.c.l.bf16 %v3876_v8  ;;  %v2767_v3 = vunpack.c.h.bf16 %v3876_v8  ;;  %v2727_v27 = vmul.f32 %v2715_v63, %v5336_v47  ;;  %s3877_s8 = scalar_lea.vmem %s2902_s7, 2048  ;;  %p3882_p1 = scmp.lt.s32.totalorder %s2902_s7, %s2902_s7 }
 0x4cc   :  { %v2743_v1 = vadd.f32 %v5379_v13, %v2723_v62  ;;  %v2728_v2 = vmul.f32 %v2715_v63, %v5341_v41  ;;  %v2729_v46 = vmul.f32 %v2715_v63, %v5346_v38  ;;  %v2744_v26 = vadd.f32 %v5379_v13, %v2724_v6  ;;  %p3878_p0 = scmp.ne.s32.totalorder %s2902_s7, %s3877_s8  ;;  %p3883_p2 = scmp.lt.s32.totalorder %s3877_s8, %s3877_s8 }
 0x4cd   :  { %v5433_v17 = vadd.f32 %v2756_v22, %v2740_v4  ;;  %v2730_v61 = vmul.f32 %v2715_v63, %v5351_v42  ;;  %v2745_v29 = vadd.f32 %v5379_v13, %v2725_v23  ;;  %v5437_v56 = vadd.f32 %v2757_v9, %v2741_v33 }
 0x4ce   :  { %v5439_v5 = vadd.f32 %v2758_v40, %v2742_v32  ;;  %v2746_v47 = vadd.f32 %v5379_v13, %v2726_v15  ;;  %v2800_v20 = vmin.f32 %v5398_v48, 0.0  ;;  %v2801_v41 = vmin.f32 %v5423_v10, 0.0  ;;  %p3884_p3 = por %p3883_p2, %p3882_p1 }
 0x4cf   :  { %v2802_v38 = vmin.f32 %v5400_v28, 0.0  ;;  %v2731_v0 = vmul.f32 %v2715_v63, %v5356_v14  ;;  %v2747_v12 = vadd.f32 %v5379_v13, %v2727_v27  ;;  %v5447_v60 = vadd.f32 %v2759_v34, %v2743_v1 }
 0x4d0   :  { %v2803_v42 = vmin.f32 %v5402_v52, 0.0  ;;  %v2748_v35 = vadd.f32 %v5379_v13, %v2728_v2  ;;  %v2749_v54 = vadd.f32 %v5379_v13, %v2729_v46  ;;  %v5452_v19 = vadd.f32 %v2760_v24, %v2744_v26  ;;  %p3885_p4 = pnand %p3884_p3, %p3878_p0 }
 0x4d1   :  { %v2804_v18 = vmin.f32 %v5433_v17, 0.0  ;;  %v2750_v36 = vadd.f32 %v5379_v13, %v2730_v61  ;;  %v5456_v57 = vadd.f32 %v2761_v59, %v2745_v29  ;;  %v2805_v14 = vmin.f32 %v5437_v56, 0.0 }
 0x4d2   :  { %v2806_v63 = vmin.f32 %v5439_v5, 0.0  ;;  %v5460_v44 = vadd.f32 %v2762_v45, %v2746_v47  ;;  %v2816_v31 = vmul.f32 1.442695, %v2800_v20  ;;  %v2818_v53 = vmul.f32 1.442695, %v2801_v41 }
 0x4d3   :  { %v2820_v39 = vmul.f32 1.442695, %v2802_v38  ;;  %v2751_v37 = vadd.f32 %v5379_v13, %v2731_v0  ;;  %v5463_v43 = vadd.f32 %v2763_v58, %v2747_v12  ;;  %v2807_v22 = vmin.f32 %v5447_v60, 0.0 }
 0x4d4   :  { %v2822_v9 = vmul.f32 1.442695, %v2803_v42  ;;  %v5466_v25 = vadd.f32 %v2764_v21, %v2748_v35  ;;  %v2808_v50 = vmin.f32 %v5452_v19, 0.0  ;;  %3833 = vpow2.f32 %v2816_v31 }
 0x4d5   :  { %v2824_v55 = vmul.f32 1.442695, %v2804_v18  ;;  %v5469_v11 = vadd.f32 %v2765_v49, %v2749_v54  ;;  %v2809_v40 = vmin.f32 %v5456_v57, 0.0  ;;  %3835 = vpow2.f32 %v2818_v53 }
 0x4d6   :  { %v2826_v34 = vmul.f32 1.442695, %v2805_v14  ;;  %v5472_v16 = vadd.f32 %v2766_v51, %v2750_v36  ;;  %v2810_v13 = vmin.f32 %v5460_v44, 0.0  ;;  %3837 = vpow2.f32 %v2820_v39 }
 0x4d7   :  { %v2828_v24 = vmul.f32 1.442695, %v2806_v63  ;;  %v5475_v62 = vadd.f32 %v2767_v3, %v2751_v37  ;;  %v2811_v59 = vmin.f32 %v5463_v43, 0.0  ;;  %3839 = vpow2.f32 %v2822_v9 }
 0x4d8   :  { %v2830_v7 = vmul.f32 1.442695, %v2807_v22  ;;  %v2812_v45 = vmin.f32 %v5466_v25, 0.0  ;;  %3841 = vpow2.f32 %v2824_v55  ;;  %v2832_v6 = vmul.f32 1.442695, %v2808_v50 }
 0x4d9   :  { %v2813_v4 = vmin.f32 %v5469_v11, 0.0  ;;  %3843 = vpow2.f32 %v2826_v34  ;;  %v2834_v58 = vmul.f32 1.442695, %v2809_v40  ;;  %v2814_v23 = vmin.f32 %v5472_v16, 0.0 }
 0x4da   :  { %3845 = vpow2.f32 %v2828_v24  ;;  %v2836_v33 = vmul.f32 1.442695, %v2810_v13  ;;  %v2815_v32 = vmin.f32 %v5475_v62, 0.0  ;;  %v2838_v30 = vmul.f32 1.442695, %v2811_v59 }
 0x4db   :  { %3847 = vpow2.f32 %v2830_v7  ;;  %v2840_v21 = vmul.f32 1.442695, %v2812_v45  ;;  %v2842_v49 = vmul.f32 1.442695, %v2813_v4  ;;  %v2844_v8 = vmul.f32 1.442695, %v2814_v23 }
 0x4dc   :  { %3849 = vpow2.f32 %v2832_v6  ;;  %v2846_v3 = vmul.f32 1.442695, %v2815_v32  ;;  %vm2784_vm5 = vcmp.gt.f32.partialorder %v5398_v48, 0.0  ;;  %vm2785_vm6 = vcmp.gt.f32.partialorder %v5423_v10, 0.0 }
 0x4dd   :  { %3851 = vpow2.f32 %v2834_v58  ;;  %vm2786_vm7 = vcmp.gt.f32.partialorder %v5400_v28, 0.0  ;;  %vm2787_vm8 = vcmp.gt.f32.partialorder %v5402_v52, 0.0  ;;  %vm2788_vm9 = vcmp.gt.f32.partialorder %v5433_v17, 0.0 }
 0x4de   :  { %v3834_v15 = vpop.eup %3833  ;;  %3853 = vpow2.f32 %v2836_v33  ;;  %vm2789_vm10 = vcmp.gt.f32.partialorder %v5437_v56, 0.0  ;;  %vm2790_vm11 = vcmp.gt.f32.partialorder %v5439_v5, 0.0  ;;  %vm2791_vm12 = vcmp.gt.f32.partialorder %v5447_v60, 0.0 }
 0x4df   :  { %v3836_v51 = vpop.eup %3835  ;;  %3855 = vpow2.f32 %v2838_v30  ;;  %v3151_v27 = vadd.f32 -1.0, %v3834_v15  ;;  %vm2792_vm13 = vcmp.gt.f32.partialorder %v5452_v19, 0.0  ;;  %vm2793_vm14 = vcmp.gt.f32.partialorder %v5456_v57, 0.0 }
 0x4e0   :  { %v3838_v1 = vpop.eup %3837  ;;  %3857 = vpow2.f32 %v2840_v21  ;;  %v3152_v2 = vadd.f32 -1.0, %v3836_v51  ;;  %vm2794_vm15 = vcmp.gt.f32.partialorder %v5460_v44, 0.0  ;;  %vm2795_vm1 = vcmp.gt.f32.partialorder %v5463_v43, 0.0 }
 0x4e1   :  { %v3840_v46 = vpop.eup %3839  ;;  %3859 = vpow2.f32 %v2842_v49  ;;  %v3153_v26 = vadd.f32 -1.0, %v3838_v1  ;;  %v2864_v61 = vsel %vm2784_vm5, %v5398_v48, %v3151_v27  ;;  %vm2796_vm2 = vcmp.gt.f32.partialorder %v5466_v25, 0.0 }
 0x4e2   :  { %v3842_v29 = vpop.eup %3841  ;;  %3861 = vpow2.f32 %v2844_v8  ;;  %v3154_v47 = vadd.f32 -1.0, %v3840_v46  ;;  %v2865_v20 = vsel %vm2785_vm6, %v5423_v10, %v3152_v2  ;;  %2880 = vst.msk [vmem:[#allocation2] sm:$0xff] %vm113_vm0, %v2864_v61  ;;  %vm2797_vm3 = vcmp.gt.f32.partialorder %v5469_v11, 0.0 }
 0x4e3   :  { %v3844_v41 = vpop.eup %3843  ;;  %3863 = vpow2.f32 %v2846_v3  ;;  %v3155_v38 = vadd.f32 -1.0, %v3842_v29  ;;  %v2866_v0 = vsel %vm2786_vm7, %v5400_v28, %v3153_v26  ;;  %2881 = vst.msk [vmem:[#allocation2 + $0x8] sm:$0xff] %vm113_vm0, %v2865_v20  ;;  %vm2798_vm4 = vcmp.gt.f32.partialorder %v5472_v16, 0.0 }
 0x4e4   :  { %v3846_v12 = vpop.eup %3845  ;;  %v3156_v48 = vadd.f32 -1.0, %v3844_v41  ;;  %v2867_v42 = vsel %vm2787_vm8, %v5402_v52, %v3154_v47  ;;  %2882 = vst.msk [vmem:[#allocation2 + $0x10] sm:$0xff] %vm113_vm0, %v2866_v0  ;;  %vm2799_vm5 = vcmp.gt.f32.partialorder %v5475_v62, 0.0 }
 0x4e5   :  { %v3848_v10 = vpop.eup %3847  ;;  %v3157_v35 = vadd.f32 -1.0, %v3846_v12  ;;  %v2868_v54 = vsel %vm2788_vm9, %v5433_v17, %v3155_v38  ;;  %2883 = vst.msk [vmem:[#allocation2 + $0x18] sm:$0xff] %vm113_vm0, %v2867_v42 }
 0x4e6   :  { %v3850_v18 = vpop.eup %3849  ;;  %v3158_v28 = vadd.f32 -1.0, %v3848_v10  ;;  %v2869_v36 = vsel %vm2789_vm10, %v5437_v56, %v3156_v48  ;;  %2884 = vst.msk [vmem:[#allocation2 + $0x20] sm:$0xff] %vm113_vm0, %v2868_v54 }
 0x4e7   :  { %v3852_v14 = vpop.eup %3851  ;;  %v3159_v52 = vadd.f32 -1.0, %v3850_v18  ;;  %v2870_v63 = vsel %vm2790_vm11, %v5439_v5, %v3157_v35  ;;  %2885 = vst.msk [vmem:[#allocation2 + $0x28] sm:$0xff] %vm113_vm0, %v2869_v36 }
 0x4e8   :  { %v3854_v31 = vpop.eup %3853  ;;  %v3160_v17 = vadd.f32 -1.0, %v3852_v14  ;;  %v2871_v53 = vsel %vm2791_vm12, %v5447_v60, %v3158_v28  ;;  %2886 = vst.msk [vmem:[#allocation2 + $0x30] sm:$0xff] %vm113_vm0, %v2870_v63 }
 0x4e9   :  { %v3856_v39 = vpop.eup %3855  ;;  %v3161_v56 = vadd.f32 -1.0, %v3854_v31  ;;  %v2872_v37 = vsel %vm2792_vm13, %v5452_v19, %v3159_v52  ;;  %2887 = vst.msk [vmem:[#allocation2 + $0x38] sm:$0xff] %vm113_vm0, %v2871_v53 }
 0x4ea   :  { %v3858_v22 = vpop.eup %3857  ;;  %v3162_v5 = vadd.f32 -1.0, %v3856_v39  ;;  %v2873_v9 = vsel %vm2793_vm14, %v5456_v57, %v3160_v17  ;;  %2888 = vst.msk [vmem:[#allocation2 + $0x40] sm:$0xff] %vm113_vm0, %v2872_v37 }
 0x4eb   :  { %v3860_v50 = vpop.eup %3859  ;;  %v3163_v60 = vadd.f32 -1.0, %v3858_v22  ;;  %v2874_v55 = vsel %vm2794_vm15, %v5460_v44, %v3161_v56  ;;  %2889 = vst.msk [vmem:[#allocation2 + $0x48] sm:$0xff] %vm113_vm0, %v2873_v9 }
 0x4ec   :  { %v3862_v19 = vpop.eup %3861  ;;  %v3164_v40 = vadd.f32 -1.0, %v3860_v50  ;;  %v2875_v34 = vsel %vm2795_vm1, %v5463_v43, %v3162_v5  ;;  %2890 = vst.msk [vmem:[#allocation2 + $0x50] sm:$0xff] %vm113_vm0, %v2874_v55 }
 0x4ed   :  { %v3864_v57 = vpop.eup %3863  ;;  %v3165_v13 = vadd.f32 -1.0, %v3862_v19  ;;  %v2876_v24 = vsel %vm2796_vm2, %v5466_v25, %v3163_v60  ;;  %2891 = vst.msk [vmem:[#allocation2 + $0x58] sm:$0xff] %vm113_vm0, %v2875_v34 }
 0x4ee   :  { %v3166_v44 = vadd.f32 -1.0, %v3864_v57  ;;  %v2877_v59 = vsel %vm2797_vm3, %v5469_v11, %v3164_v40  ;;  %2892 = vst.msk [vmem:[#allocation2 + $0x60] sm:$0xff] %vm113_vm0, %v2876_v24 }
 0x4ef   :  { %v2878_v43 = vsel %vm2798_vm4, %v5472_v16, %v3165_v13  ;;  %2893 = vst.msk [vmem:[#allocation2 + $0x68] sm:$0xff] %vm113_vm0, %v2877_v59 }
 0x4f0   :  { %v2879_v7 = vsel %vm2799_vm5, %v5475_v62, %v3166_v44  ;;  %2894 = vst.msk [vmem:[#allocation2 + $0x70] sm:$0xff] %vm113_vm0, %v2878_v43 }
 0x4f1   :  { %2895 = vst.msk [vmem:[#allocation2 + $0x78] sm:$0xff] %vm113_vm0, %v2879_v7 }
 0x4f2   :  { %3888 = shalt.err (!%p3885_p4)
}
 0x4f3   :  { %s3889_s11 = scalar_lea.hbm %s5548_s6, 2048 }
 0x4f4   :  { %p3890_p5 = scmp.ne.s32.totalorder %s5548_s6, %s3889_s11  ;;  %p3893_p6 = scmp.lt.u32.totalorder %s3889_s11, %s5548_s6 }
 0x4f6   :  { %p3895_p7 = pnand %p3893_p6, %p3890_p5 }
 0x4f8   :  { %3898 = shalt.err (!%p3895_p7)
}
 0x4f9   :  { %s3903_s4 = smov 128   ;;  %s3904_s14 = smov 8  }
 0x4fa   :  { %2907 = dma.vmem_to_hbm [thread:$0]  %s2902_s7, 2048, %s5548_s6, [#allocation3], %s3903_s4, %s3903_s4, %s3904_s14  }
 0x4fb   :  { %3899 = dma.done.wait [#allocation3], 2048  }
 0x4fc   :  { %3900 = vsyncadd [#allocation3], 4294965248 }
 0x4fd   :  { %2911 = vsyncpa [#allocation3], 1 }

</bundles_post_ra>
